<compile_context>
chip_gen: v7x
topology: tpu7x:2x2x1
jax: 0.10.0
libtpu: 0.0.40
codegen_flags: <defaults>
</compile_context>

<pallas_src>
import math

import jax
import jax.numpy as jnp
from jax.experimental import pallas as pl
from jax.experimental.pallas import tpu as pltpu


def _round_up(x, m):
    return ((x + m - 1) // m) * m


def _cyc(x, k, use_roll):
    """out[..., i] = x[..., (i + k) % n] for a static integer k (cyclic shift)."""
    n = x.shape[-1]
    s = (-k) % n  # equivalent jnp.roll shift
    if s == 0:
        return x
    if use_roll and n % 128 == 0 and x.shape[-2] % 8 == 0:
        # Lane-aligned: single XLU lane rotate; co-issues for free next to the VPU work.
        return pltpu.roll(x, s, axis=x.ndim - 1)  # axis must be non-negative
    # Fallback for lane-unaligned state widths (or if the roll path is unavailable).
    # TODO(synk): for real Lorenz-96 sizes (x_dim=40, ...) pad the state to a multiple of
    # 128 lanes once in the wrapper instead of taking this concat path.
    kk = k % n
    return jnp.concatenate([x[..., kk:], x[..., :kk]], axis=-1)


def _make_fused_kernel(num_layers, forcing, use_roll):
    forcing = float(forcing)

    def kernel(*refs):
        u_ref = refs[0]
        o_ref = refs[-1]
        wb_refs = refs[1:-1]  # w0, b0, w1, b1, ...

        u = u_ref[...]  # (tb, x_dim) f32 in VMEM
        # base(u): Lorenz-96 RHS  (u[i+1] - u[i-2]) * u[i-1] - u[i] + F   (cyclic), f32 VPU.
        v = (_cyc(u, 1, use_roll) - _cyc(u, -2, use_roll)) * _cyc(u, -1, use_roll) \
            - u + forcing
        v = jnp.maximum(v, 0.0)  # relu(base(u))

        for li in range(num_layers):
            w = wb_refs[2 * li][...]       # (in_i, out_i) bf16, resident
            b = wb_refs[2 * li + 1][...]   # (1, out_i)    f32
            # bf16 x bf16 operands -> f32 accumulate: native single-pass MXU path.
            v = jnp.dot(v.astype(jnp.bfloat16), w,
                        preferred_element_type=jnp.float32) + b
            if li < num_layers - 1:
                v = jnp.maximum(v, 0.0)    # relu on hidden layers only (f32 VPU)

        o_ref[...] = v.astype(o_ref.dtype)  # single lane-dense store

    return kernel


def prepare_params(weights, biases):
    """One-time parameter prep; call OUTSIDE the ODE-solver step loop.

    weights: list of (out_i, in_i) arrays (PyTorch nn.Linear layout) -> (in_i, out_i) bf16
    biases:  list of (out_i,) arrays                                 -> (1, out_i)    f32
    """
    w_t = tuple(jnp.asarray(w, jnp.float32).T.astype(jnp.bfloat16) for w in weights)
    b_r = tuple(jnp.asarray(b, jnp.float32).reshape(1, -1) for b in biases)
    return w_t, b_r


def _pick_batch_tile(B, block_b, min_steps):
    """Largest multiple-of-8 tile that still leaves >= min_steps grid steps."""
    tb = max(8, _round_up(min(block_b, _round_up(B, 8)), 8))
    while tb > 8 and (B + tb - 1) // tb < min_steps:
        tb = max(8, _round_up(tb // 2, 8))
    return tb


def ode_net_from_basenet_forward(t, u, F, params, *, block_b=1024, min_grid_steps=4):
    """Matches ODE_Net_from_basenet.forward(t, u) with base = Lorenz-96 RHS.

    params = prepare_params(weights, biases)  (done once, outside the solver loop)
    u: (..., x_dim)
    """
    del t  # unused, kept for signature parity with forward(t, u)
    w_t, b_r = params
    num_layers = len(w_t)
    x_dim = u.shape[-1]
    out_dim = int(w_t[-1].shape[-1])
    lead = u.shape[:-1]
    B = math.prod(lead) if lead else 1
    u2 = u.reshape(B, x_dim).astype(jnp.float32)

    tb = _pick_batch_tile(B, block_b, min_grid_steps)
    B_pad = _round_up(B, tb)
    if B_pad != B:
        u2 = jnp.pad(u2, ((0, B_pad - B), (0, 0)))

    flat_wb = []
    for w, b in zip(w_t, b_r):
        flat_wb.extend([w, b])

    # Advisory cost for XLA's scheduler (MXU flops + VPU elementwise, HBM bytes).
    wsum = sum(int(w.shape[0]) * int(w.shape[1]) for w in w_t)
    cost = pl.CostEstimate(
        flops=2 * B_pad * wsum + 5 * B_pad * x_dim,
        transcendentals=0,
        bytes_accessed=(u2.size * 4 + sum(w.size * 2 for w in w_t)
                        + sum(b.size * 4 for b in b_r) + B_pad * out_dim * 4),
    )

    # Resident weights + activations VMEM estimate; raise the scoped limit only if needed.
    wb_bytes = sum(w.size * 2 for w in w_t) + sum(b.size * 4 for b in b_r)
    widest = max([x_dim, out_dim] + [int(w.shape[1]) for w in w_t])
    vmem_need = 2 * wb_bytes + 2 * tb * x_dim * 4 + 2 * tb * out_dim * 4 + 4 * tb * widest * 4
    vmem_limit = None if vmem_need <= 32 * 1024 * 1024 \
        else int(min(vmem_need * 2, 128 * 1024 * 1024))
    # TODO(synk): if resident weights alone approach ~half of v7x's 64 MiB VMEM, switch to
    # an extra K/N grid axis (or pltpu.emit_pipeline per layer) instead of all-resident.

    def build(single_buffer_weights, use_roll):
        def resident_spec(shape):
            if single_buffer_weights:
                return pl.BlockSpec(shape, lambda i: (0,) * len(shape),
                                    pipeline_mode=pl.Buffered(1))
            return pl.BlockSpec(shape, lambda i: (0,) * len(shape))

        in_specs = [pl.BlockSpec((tb, x_dim), lambda i: (i, 0))]
        for w, b in zip(w_t, b_r):
            in_specs.append(resident_spec(w.shape))
            in_specs.append(resident_spec(b.shape))

        return pl.pallas_call(
            _make_fused_kernel(num_layers, F, use_roll),
            out_shape=jax.ShapeDtypeStruct((B_pad, out_dim), jnp.float32),
            grid_spec=pltpu.PrefetchScalarGridSpec(
                num_scalar_prefetch=0,
                grid=(B_pad // tb,),
                in_specs=in_specs,
                out_specs=pl.BlockSpec((tb, out_dim), lambda i: (i, 0)),
            ),
            compiler_params=pltpu.CompilerParams(
                dimension_semantics=("parallel",),  # batch tiles split across v7x's 2 TCs
                vmem_limit_bytes=vmem_limit,
            ),
            cost_estimate=cost,
        )

    # Preferred config first; degrade gracefully if this jax/mosaic build lacks
    # pl.Buffered single-buffering or the XLU roll path (e.g. interpret mode).
    last_err = None
    out2 = None
    for single_buf, use_roll in ((True, True), (False, True), (False, False)):
        try:
            out2 = build(single_buf, use_roll)(u2, *flat_wb)
            break
        except Exception as e:  # noqa: BLE001 - fall through to the next variant
            last_err = e
    if out2 is None:
        raise last_err

    return out2[:B].reshape(*lead, out_dim)


def _ref_forward(u2, F, weights, biases):
    """Pure-JAX reference mirroring the kernel math (bf16 MXU operands, f32 accumulate)."""
    u_p1 = jnp.roll(u2, -1, axis=-1)  # u[(i+1)%n]
    u_m2 = jnp.roll(u2, 2, axis=-1)   # u[(i-2)%n]
    u_m1 = jnp.roll(u2, 1, axis=-1)   # u[(i-1)%n]
    v = (u_p1 - u_m2) * u_m1 - u2 + F
    v = jnp.maximum(v, 0.0)
    n_layers = len(weights)
    for i in range(n_layers):
        v = jnp.dot(v.astype(jnp.bfloat16), weights[i].T.astype(jnp.bfloat16),
                    preferred_element_type=jnp.float32) + biases[i]
        if i < n_layers - 1:
            v = jnp.maximum(v, 0.0)
    return v


if __name__ == "__main__":
    F = 8.0
    x_dim = 128                               # lane-aligned Lorenz-96 state dimension
    hidden_layer_widths = [x_dim, 256, 128]   # base-out -> hidden -> out
    n_ens, n_batch = 4, 32                    # small leading dims (ensemble x batch)

    key = jax.random.PRNGKey(0)
    num_linear = len(hidden_layer_widths) - 1
    keys = jax.random.split(key, 1 + 2 * num_linear)

    u = jax.random.normal(keys[0], (n_ens, n_batch, x_dim), dtype=jnp.float32)

    # PyTorch nn.Linear default init: U(-1/sqrt(fan_in), 1/sqrt(fan_in))
    weights, biases = [], []
    for li in range(num_linear):
        fan_in = hidden_layer_widths[li]
        fan_out = hidden_layer_widths[li + 1]
        bound = 1.0 / math.sqrt(fan_in)
        weights.append(jax.random.uniform(
            keys[1 + 2 * li], (fan_out, fan_in), jnp.float32, -bound, bound))
        biases.append(jax.random.uniform(
            keys[2 + 2 * li], (fan_out,), jnp.float32, -bound, bound))

    # One-time param prep (transpose + bf16 cast) -- hoisted out of the solver step.
    params = prepare_params(weights, biases)

    t = jnp.float32(0.0)  # unused, signature parity with forward(t, u)
    out = ode_net_from_basenet_forward(t, u, F, params)
    out = jax.block_until_ready(out)

    ref = _ref_forward(u.reshape(-1, x_dim), F, weights, biases)
    ref = ref.reshape(n_ens, n_batch, hidden_layer_widths[-1])

    assert out.shape == (n_ens, n_batch, hidden_layer_widths[-1])
    max_err = jnp.max(jnp.abs(out - ref))
    assert jnp.allclose(out, ref, atol=5e-2, rtol=5e-2), f"mismatch vs reference: {max_err}"

    print("KERNEL_OK")
</pallas_src>

<mosaic_0001>
module attributes {stable_mosaic.version = 11 : i64} {
  func.func @kernel(%arg0: i32, %arg1: memref<32x128xf32, #tpu.memory_space<vmem>>, %arg2: memref<128x256xbf16, #tpu.memory_space<vmem>>, %arg3: memref<1x256xf32, #tpu.memory_space<vmem>>, %arg4: memref<256x128xbf16, #tpu.memory_space<vmem>>, %arg5: memref<1x128xf32, #tpu.memory_space<vmem>>, %arg6: memref<32x128xf32, #tpu.memory_space<vmem>>) attributes {dimension_semantics = [#tpu.dimension_semantics<parallel>], iteration_bounds = array<i64: 4>, scalar_prefetch = 0 : i64, scratch_operands = 0 : i64, tpu.core_type = #tpu.core_type<tc>, window_params = [{transform_indices = @transform_0, window_bounds = array<i64: 32, 128>}, {pipeline_mode = #tpu.pipeline_mode<synchronous>, transform_indices = @transform_1, window_bounds = array<i64: 128, 256>}, {pipeline_mode = #tpu.pipeline_mode<synchronous>, transform_indices = @transform_2, window_bounds = array<i64: 1, 256>}, {pipeline_mode = #tpu.pipeline_mode<synchronous>, transform_indices = @transform_3, window_bounds = array<i64: 256, 128>}, {pipeline_mode = #tpu.pipeline_mode<synchronous>, transform_indices = @transform_4, window_bounds = array<i64: 1, 128>}, {transform_indices = @transform_5, window_bounds = array<i64: 32, 128>}]} {
    %c0 = arith.constant 0 : index
    %c0_0 = arith.constant 0 : index
    %0 = vector.load %arg1[%c0, %c0_0] : memref<32x128xf32, #tpu.memory_space<vmem>>, vector<32x128xf32>
    %c127_i32 = arith.constant 127 : i32
    %1 = tpu.dynamic_rotate %0 by %c127_i32 dim 1 : vector<32x128xf32>, i32 -> vector<32x128xf32>
    %c2_i32 = arith.constant 2 : i32
    %2 = tpu.dynamic_rotate %0 by %c2_i32 dim 1 : vector<32x128xf32>, i32 -> vector<32x128xf32>
    %3 = arith.subf %1, %2 : vector<32x128xf32>
    %c1_i32 = arith.constant 1 : i32
    %4 = tpu.dynamic_rotate %0 by %c1_i32 dim 1 : vector<32x128xf32>, i32 -> vector<32x128xf32>
    %5 = arith.mulf %3, %4 : vector<32x128xf32>
    %6 = arith.subf %5, %0 : vector<32x128xf32>
    %cst = arith.constant 8.000000e+00 : f32
    %7 = vector.broadcast %cst : f32 to vector<32x128xf32>
    %8 = arith.addf %6, %7 : vector<32x128xf32>
    %cst_1 = arith.constant 0.000000e+00 : f32
    %9 = vector.broadcast %cst_1 : f32 to vector<32x128xf32>
    %10 = arith.maximumf %8, %9 : vector<32x128xf32>
    %c0_2 = arith.constant 0 : index
    %c0_3 = arith.constant 0 : index
    %11 = vector.load %arg2[%c0_2, %c0_3] : memref<128x256xbf16, #tpu.memory_space<vmem>>, vector<128x256xbf16>
    %c0_4 = arith.constant 0 : index
    %c0_5 = arith.constant 0 : index
    %12 = vector.load %arg3[%c0_4, %c0_5] : memref<1x256xf32, #tpu.memory_space<vmem>>, vector<1x256xf32>
    %13 = arith.truncf %10 : vector<32x128xf32> to vector<32x128xbf16>
    %cst_6 = arith.constant dense<0.000000e+00> : vector<32x256xf32>
    %14 = tpu.matmul %13, %11, %cst_6 {dimension_numbers = #tpu.dot_dimension_numbers<[1], [0], [0], [1], [0, 0, 1, 1], [], []>} : vector<32x128xbf16>, vector<128x256xbf16>, vector<32x256xf32> -> vector<32x256xf32>
    %15 = vector.broadcast %12 : vector<1x256xf32> to vector<32x256xf32>
    %16 = arith.addf %14, %15 : vector<32x256xf32>
    %cst_7 = arith.constant 0.000000e+00 : f32
    %17 = vector.broadcast %cst_7 : f32 to vector<32x256xf32>
    %18 = arith.maximumf %16, %17 : vector<32x256xf32>
    %c0_8 = arith.constant 0 : index
    %c0_9 = arith.constant 0 : index
    %19 = vector.load %arg4[%c0_8, %c0_9] : memref<256x128xbf16, #tpu.memory_space<vmem>>, vector<256x128xbf16>
    %c0_10 = arith.constant 0 : index
    %c0_11 = arith.constant 0 : index
    %20 = vector.load %arg5[%c0_10, %c0_11] : memref<1x128xf32, #tpu.memory_space<vmem>>, vector<1x128xf32>
    %21 = arith.truncf %18 : vector<32x256xf32> to vector<32x256xbf16>
    %cst_12 = arith.constant dense<0.000000e+00> : vector<32x128xf32>
    %22 = tpu.matmul %21, %19, %cst_12 {dimension_numbers = #tpu.dot_dimension_numbers<[1], [0], [0], [1], [0, 0, 1, 1], [], []>} : vector<32x256xbf16>, vector<256x128xbf16>, vector<32x128xf32> -> vector<32x128xf32>
    %23 = vector.broadcast %20 : vector<1x128xf32> to vector<32x128xf32>
    %24 = arith.addf %22, %23 : vector<32x128xf32>
    %c0_13 = arith.constant 0 : index
    %c0_14 = arith.constant 0 : index
    %25 = vector.load %arg6[%c0_13, %c0_14] : memref<32x128xf32, #tpu.memory_space<vmem>>, vector<32x128xf32>
    tpu.vector_store %arg6[%c0_13, %c0_14], %24 {strides = array<i32>} : memref<32x128xf32, #tpu.memory_space<vmem>>, vector<32x128xf32>,
    return
  }
  func.func @transform_0(%arg0: i32) -> (i32, i32) {
    %c0_i32 = arith.constant 0 : i32
    %c0_i32_0 = arith.constant 0 : i32
    return %arg0, %c0_i32 : i32, i32
  }
  func.func @transform_1(%arg0: i32) -> (i32, i32) {
    %c0_i32 = arith.constant 0 : i32
    %c0_i32_0 = arith.constant 0 : i32
    %c0_i32_1 = arith.constant 0 : i32
    return %c0_i32, %c0_i32_0 : i32, i32
  }
  func.func @transform_2(%arg0: i32) -> (i32, i32) {
    %c0_i32 = arith.constant 0 : i32
    %c0_i32_0 = arith.constant 0 : i32
    %c0_i32_1 = arith.constant 0 : i32
    return %c0_i32, %c0_i32_0 : i32, i32
  }
  func.func @transform_3(%arg0: i32) -> (i32, i32) {
    %c0_i32 = arith.constant 0 : i32
    %c0_i32_0 = arith.constant 0 : i32
    %c0_i32_1 = arith.constant 0 : i32
    return %c0_i32, %c0_i32_0 : i32, i32
  }
  func.func @transform_4(%arg0: i32) -> (i32, i32) {
    %c0_i32 = arith.constant 0 : i32
    %c0_i32_0 = arith.constant 0 : i32
    %c0_i32_1 = arith.constant 0 : i32
    return %c0_i32, %c0_i32_0 : i32, i32
  }
  func.func @transform_5(%arg0: i32) -> (i32, i32) {
    %c0_i32 = arith.constant 0 : i32
    %c0_i32_0 = arith.constant 0 : i32
    return %arg0, %c0_i32 : i32, i32
  }
}

module attributes {stable_mosaic.version = 11 : i64} {
  func.func @kernel(%arg0: i32, %arg1: memref<32x128xf32, #tpu.memory_space<vmem>>, %arg2: memref<128x256xbf16, #tpu.memory_space<vmem>>, %arg3: memref<1x256xf32, #tpu.memory_space<vmem>>, %arg4: memref<256x128xbf16, #tpu.memory_space<vmem>>, %arg5: memref<1x128xf32, #tpu.memory_space<vmem>>, %arg6: memref<32x128xf32, #tpu.memory_space<vmem>>) attributes {dimension_semantics = [#tpu.dimension_semantics<parallel>], iteration_bounds = array<i64: 4>, scalar_prefetch = 0 : i64, scratch_operands = 0 : i64, tpu.core_type = #tpu.core_type<tc>, window_params = [{transform_indices = @transform_0, window_bounds = array<i64: 32, 128>}, {pipeline_mode = #tpu.pipeline_mode<synchronous>, transform_indices = @transform_1, window_bounds = array<i64: 128, 256>}, {pipeline_mode = #tpu.pipeline_mode<synchronous>, transform_indices = @transform_2, window_bounds = array<i64: 1, 256>}, {pipeline_mode = #tpu.pipeline_mode<synchronous>, transform_indices = @transform_3, window_bounds = array<i64: 256, 128>}, {pipeline_mode = #tpu.pipeline_mode<synchronous>, transform_indices = @transform_4, window_bounds = array<i64: 1, 128>}, {transform_indices = @transform_5, window_bounds = array<i64: 32, 128>}]} {
    %c0 = arith.constant 0 : index
    %c0_0 = arith.constant 0 : index
    %0 = vector.load %arg1[%c0, %c0_0] : memref<32x128xf32, #tpu.memory_space<vmem>>, vector<32x128xf32>
    %c127_i32 = arith.constant 127 : i32
    %1 = tpu.dynamic_rotate %0 by %c127_i32 dim 1 : vector<32x128xf32>, i32 -> vector<32x128xf32>
    %c2_i32 = arith.constant 2 : i32
    %2 = tpu.dynamic_rotate %0 by %c2_i32 dim 1 : vector<32x128xf32>, i32 -> vector<32x128xf32>
    %3 = arith.subf %1, %2 : vector<32x128xf32>
    %c1_i32 = arith.constant 1 : i32
    %4 = tpu.dynamic_rotate %0 by %c1_i32 dim 1 : vector<32x128xf32>, i32 -> vector<32x128xf32>
    %5 = arith.mulf %3, %4 : vector<32x128xf32>
    %6 = arith.subf %5, %0 : vector<32x128xf32>
    %cst = arith.constant 8.000000e+00 : f32
    %7 = vector.broadcast %cst : f32 to vector<32x128xf32>
    %8 = arith.addf %6, %7 : vector<32x128xf32>
    %cst_1 = arith.constant 0.000000e+00 : f32
    %9 = vector.broadcast %cst_1 : f32 to vector<32x128xf32>
    %10 = arith.maximumf %8, %9 : vector<32x128xf32>
    %c0_2 = arith.constant 0 : index
    %c0_3 = arith.constant 0 : index
    %11 = vector.load %arg2[%c0_2, %c0_3] : memref<128x256xbf16, #tpu.memory_space<vmem>>, vector<128x256xbf16>
    %c0_4 = arith.constant 0 : index
    %c0_5 = arith.constant 0 : index
    %12 = vector.load %arg3[%c0_4, %c0_5] : memref<1x256xf32, #tpu.memory_space<vmem>>, vector<1x256xf32>
    %13 = arith.truncf %10 : vector<32x128xf32> to vector<32x128xbf16>
    %cst_6 = arith.constant dense<0.000000e+00> : vector<32x256xf32>
    %14 = tpu.matmul %13, %11, %cst_6 {dimension_numbers = #tpu.dot_dimension_numbers<[1], [0], [0], [1], [0, 0, 1, 1], [], []>} : vector<32x128xbf16>, vector<128x256xbf16>, vector<32x256xf32> -> vector<32x256xf32>
    %15 = vector.broadcast %12 : vector<1x256xf32> to vector<32x256xf32>
    %16 = arith.addf %14, %15 : vector<32x256xf32>
    %cst_7 = arith.constant 0.000000e+00 : f32
    %17 = vector.broadcast %cst_7 : f32 to vector<32x256xf32>
    %18 = arith.maximumf %16, %17 : vector<32x256xf32>
    %c0_8 = arith.constant 0 : index
    %c0_9 = arith.constant 0 : index
    %19 = vector.load %arg4[%c0_8, %c0_9] : memref<256x128xbf16, #tpu.memory_space<vmem>>, vector<256x128xbf16>
    %c0_10 = arith.constant 0 : index
    %c0_11 = arith.constant 0 : index
    %20 = vector.load %arg5[%c0_10, %c0_11] : memref<1x128xf32, #tpu.memory_space<vmem>>, vector<1x128xf32>
    %21 = arith.truncf %18 : vector<32x256xf32> to vector<32x256xbf16>
    %cst_12 = arith.constant dense<0.000000e+00> : vector<32x128xf32>
    %22 = tpu.matmul %21, %19, %cst_12 {dimension_numbers = #tpu.dot_dimension_numbers<[1], [0], [0], [1], [0, 0, 1, 1], [], []>} : vector<32x256xbf16>, vector<256x128xbf16>, vector<32x128xf32> -> vector<32x128xf32>
    %23 = vector.broadcast %20 : vector<1x128xf32> to vector<32x128xf32>
    %24 = arith.addf %22, %23 : vector<32x128xf32>
    %c0_13 = arith.constant 0 : index
    %c0_14 = arith.constant 0 : index
    %25 = vector.load %arg6[%c0_13, %c0_14] : memref<32x128xf32, #tpu.memory_space<vmem>>, vector<32x128xf32>
    tpu.vector_store %arg6[%c0_13, %c0_14], %24 {strides = array<i32>} : memref<32x128xf32, #tpu.memory_space<vmem>>, vector<32x128xf32>,
    return
  }
  func.func @transform_0(%arg0: i32) -> (i32, i32) {
    %c0_i32 = arith.constant 0 : i32
    %c0_i32_0 = arith.constant 0 : i32
    return %arg0, %c0_i32 : i32, i32
  }
  func.func @transform_1(%arg0: i32) -> (i32, i32) {
    %c0_i32 = arith.constant 0 : i32
    %c0_i32_0 = arith.constant 0 : i32
    %c0_i32_1 = arith.constant 0 : i32
    return %c0_i32, %c0_i32_0 : i32, i32
  }
  func.func @transform_2(%arg0: i32) -> (i32, i32) {
    %c0_i32 = arith.constant 0 : i32
    %c0_i32_0 = arith.constant 0 : i32
    %c0_i32_1 = arith.constant 0 : i32
    return %c0_i32, %c0_i32_0 : i32, i32
  }
  func.func @transform_3(%arg0: i32) -> (i32, i32) {
    %c0_i32 = arith.constant 0 : i32
    %c0_i32_0 = arith.constant 0 : i32
    %c0_i32_1 = arith.constant 0 : i32
    return %c0_i32, %c0_i32_0 : i32, i32
  }
  func.func @transform_4(%arg0: i32) -> (i32, i32) {
    %c0_i32 = arith.constant 0 : i32
    %c0_i32_0 = arith.constant 0 : i32
    %c0_i32_1 = arith.constant 0 : i32
    return %c0_i32, %c0_i32_0 : i32, i32
  }
  func.func @transform_5(%arg0: i32) -> (i32, i32) {
    %c0_i32 = arith.constant 0 : i32
    %c0_i32_0 = arith.constant 0 : i32
    return %arg0, %c0_i32 : i32, i32
  }
}

module attributes {stable_mosaic.version = 11 : i64} {
  func.func @kernel(%arg0: i32, %arg1: memref<32x128xf32, #tpu.memory_space<vmem>>, %arg2: memref<128x256xbf16, #tpu.memory_space<vmem>>, %arg3: memref<1x256xf32, #tpu.memory_space<vmem>>, %arg4: memref<256x128xbf16, #tpu.memory_space<vmem>>, %arg5: memref<1x128xf32, #tpu.memory_space<vmem>>, %arg6: memref<32x128xf32, #tpu.memory_space<vmem>>) attributes {dimension_semantics = [#tpu.dimension_semantics<parallel>], iteration_bounds = array<i64: 4>, scalar_prefetch = 0 : i64, scratch_operands = 0 : i64, tpu.core_type = #tpu.core_type<tc>, window_params = [{transform_indices = @transform_0, window_bounds = array<i64: 32, 128>}, {pipeline_mode = #tpu.pipeline_mode<synchronous>, transform_indices = @transform_1, window_bounds = array<i64: 128, 256>}, {pipeline_mode = #tpu.pipeline_mode<synchronous>, transform_indices = @transform_2, window_bounds = array<i64: 1, 256>}, {pipeline_mode = #tpu.pipeline_mode<synchronous>, transform_indices = @transform_3, window_bounds = array<i64: 256, 128>}, {pipeline_mode = #tpu.pipeline_mode<synchronous>, transform_indices = @transform_4, window_bounds = array<i64: 1, 128>}, {transform_indices = @transform_5, window_bounds = array<i64: 32, 128>}]} {
    %c0 = arith.constant 0 : index
    %c0_0 = arith.constant 0 : index
    %0 = vector.load %arg1[%c0, %c0_0] : memref<32x128xf32, #tpu.memory_space<vmem>>, vector<32x128xf32>
    %1 = vector.extract_strided_slice %0 {offsets = [0, 1], sizes = [32, 127], strides = [1, 1]} : vector<32x128xf32> to vector<32x127xf32>
    %2 = vector.extract_strided_slice %0 {offsets = [0, 0], sizes = [32, 1], strides = [1, 1]} : vector<32x128xf32> to vector<32x1xf32>
    %3 = tpu.concatenate %1, %2 in 1 : vector<32x127xf32>, vector<32x1xf32> -> vector<32x128xf32>
    %4 = vector.extract_strided_slice %0 {offsets = [0, 126], sizes = [32, 2], strides = [1, 1]} : vector<32x128xf32> to vector<32x2xf32>
    %5 = vector.extract_strided_slice %0 {offsets = [0, 0], sizes = [32, 126], strides = [1, 1]} : vector<32x128xf32> to vector<32x126xf32>
    %6 = tpu.concatenate %4, %5 in 1 : vector<32x2xf32>, vector<32x126xf32> -> vector<32x128xf32>
    %7 = arith.subf %3, %6 : vector<32x128xf32>
    %8 = vector.extract_strided_slice %0 {offsets = [0, 127], sizes = [32, 1], strides = [1, 1]} : vector<32x128xf32> to vector<32x1xf32>
    %9 = vector.extract_strided_slice %0 {offsets = [0, 0], sizes = [32, 127], strides = [1, 1]} : vector<32x128xf32> to vector<32x127xf32>
    %10 = tpu.concatenate %8, %9 in 1 : vector<32x1xf32>, vector<32x127xf32> -> vector<32x128xf32>
    %11 = arith.mulf %7, %10 : vector<32x128xf32>
    %12 = arith.subf %11, %0 : vector<32x128xf32>
    %cst = arith.constant 8.000000e+00 : f32
    %13 = vector.broadcast %cst : f32 to vector<32x128xf32>
    %14 = arith.addf %12, %13 : vector<32x128xf32>
    %cst_1 = arith.constant 0.000000e+00 : f32
    %15 = vector.broadcast %cst_1 : f32 to vector<32x128xf32>
    %16 = arith.maximumf %14, %15 : vector<32x128xf32>
    %c0_2 = arith.constant 0 : index
    %c0_3 = arith.constant 0 : index
    %17 = vector.load %arg2[%c0_2, %c0_3] : memref<128x256xbf16, #tpu.memory_space<vmem>>, vector<128x256xbf16>
    %c0_4 = arith.constant 0 : index
    %c0_5 = arith.constant 0 : index
    %18 = vector.load %arg3[%c0_4, %c0_5] : memref<1x256xf32, #tpu.memory_space<vmem>>, vector<1x256xf32>
    %19 = arith.truncf %16 : vector<32x128xf32> to vector<32x128xbf16>
    %cst_6 = arith.constant dense<0.000000e+00> : vector<32x256xf32>
    %20 = tpu.matmul %19, %17, %cst_6 {dimension_numbers = #tpu.dot_dimension_numbers<[1], [0], [0], [1], [0, 0, 1, 1], [], []>} : vector<32x128xbf16>, vector<128x256xbf16>, vector<32x256xf32> -> vector<32x256xf32>
    %21 = vector.broadcast %18 : vector<1x256xf32> to vector<32x256xf32>
    %22 = arith.addf %20, %21 : vector<32x256xf32>
    %cst_7 = arith.constant 0.000000e+00 : f32
    %23 = vector.broadcast %cst_7 : f32 to vector<32x256xf32>
    %24 = arith.maximumf %22, %23 : vector<32x256xf32>
    %c0_8 = arith.constant 0 : index
    %c0_9 = arith.constant 0 : index
    %25 = vector.load %arg4[%c0_8, %c0_9] : memref<256x128xbf16, #tpu.memory_space<vmem>>, vector<256x128xbf16>
    %c0_10 = arith.constant 0 : index
    %c0_11 = arith.constant 0 : index
    %26 = vector.load %arg5[%c0_10, %c0_11] : memref<1x128xf32, #tpu.memory_space<vmem>>, vector<1x128xf32>
    %27 = arith.truncf %24 : vector<32x256xf32> to vector<32x256xbf16>
    %cst_12 = arith.constant dense<0.000000e+00> : vector<32x128xf32>
    %28 = tpu.matmul %27, %25, %cst_12 {dimension_numbers = #tpu.dot_dimension_numbers<[1], [0], [0], [1], [0, 0, 1, 1], [], []>} : vector<32x256xbf16>, vector<256x128xbf16>, vector<32x128xf32> -> vector<32x128xf32>
    %29 = vector.broadcast %26 : vector<1x128xf32> to vector<32x128xf32>
    %30 = arith.addf %28, %29 : vector<32x128xf32>
    %c0_13 = arith.constant 0 : index
    %c0_14 = arith.constant 0 : index
    %31 = vector.load %arg6[%c0_13, %c0_14] : memref<32x128xf32, #tpu.memory_space<vmem>>, vector<32x128xf32>
    tpu.vector_store %arg6[%c0_13, %c0_14], %30 {strides = array<i32>} : memref<32x128xf32, #tpu.memory_space<vmem>>, vector<32x128xf32>,
    return
  }
  func.func @transform_0(%arg0: i32) -> (i32, i32) {
    %c0_i32 = arith.constant 0 : i32
    %c0_i32_0 = arith.constant 0 : i32
    return %arg0, %c0_i32 : i32, i32
  }
  func.func @transform_1(%arg0: i32) -> (i32, i32) {
    %c0_i32 = arith.constant 0 : i32
    %c0_i32_0 = arith.constant 0 : i32
    %c0_i32_1 = arith.constant 0 : i32
    return %c0_i32, %c0_i32_0 : i32, i32
  }
  func.func @transform_2(%arg0: i32) -> (i32, i32) {
    %c0_i32 = arith.constant 0 : i32
    %c0_i32_0 = arith.constant 0 : i32
    %c0_i32_1 = arith.constant 0 : i32
    return %c0_i32, %c0_i32_0 : i32, i32
  }
  func.func @transform_3(%arg0: i32) -> (i32, i32) {
    %c0_i32 = arith.constant 0 : i32
    %c0_i32_0 = arith.constant 0 : i32
    %c0_i32_1 = arith.constant 0 : i32
    return %c0_i32, %c0_i32_0 : i32, i32
  }
  func.func @transform_4(%arg0: i32) -> (i32, i32) {
    %c0_i32 = arith.constant 0 : i32
    %c0_i32_0 = arith.constant 0 : i32
    %c0_i32_1 = arith.constant 0 : i32
    return %c0_i32, %c0_i32_0 : i32, i32
  }
  func.func @transform_5(%arg0: i32) -> (i32, i32) {
    %c0_i32 = arith.constant 0 : i32
    %c0_i32_0 = arith.constant 0 : i32
    return %arg0, %c0_i32 : i32, i32
  }
}

</mosaic_0001>

<bundles_post_ra>
// kernel: tpu_custom_call.1
= control target key start
LH: loop header
LB: loop body
LE: loop exit
PB: predicated region body
PF: predicated region fallthrough
CT: control target
= control target key end

     0   :  { %10 = vsyncpa [#allocation3], 0  ;;  %s1463_s0 = inlined_call_operand.hbm [shape: f32[128,128], index: 0, kind: input, shape index: {}]   ;;  %s1464_s1 = inlined_call_operand.hbm [shape: bf16[128,256], index: 1, kind: input, shape index: {}]   ;;  %s1465_s2 = inlined_call_operand.vmem [shape: f32[1,256], index: 2, kind: input, shape index: {}]   ;;  %s1466_s3 = inlined_call_operand.hbm [shape: bf16[256,128], index: 3, kind: input, shape index: {}]   ;;  %s1467_s4 = inlined_call_operand.vmem [shape: f32[1,128], index: 4, kind: input, shape index: {}]   ;;  %s1468_s5 = inlined_call_operand.hbm [shape: f32[128,128], index: 5, kind: output, shape index: {}]  }
   0x1   :  { %12 = vsyncpa [#allocation3 + $0x1], 0 }
   0x2   :  { %13 = vsyncpa [#allocation6], 0 }
   0x3   :  { %14 = vsyncpa [#allocation4], 0 }
   0x4   :  { %16 = vsyncpa [#allocation4 + $0x1], 0  ;;  %s1192_s18 = smov 0   ;;  %s1194_s19 = smov 0  }
   0x5   :  { %s1196_s20 = smov 0   ;;  %s1198_s21 = smov 0  }
   0x6 LB: > { %s1213_s22 = sadd.s32 4294967295, %s1146_s21   ;;  %s792_s23 = sadd.s32 4294967294, %s1146_s21   ;;  %s1146_s21 = sphi %s1198_s21, %s1487_s21   ;;  %s1142_s20 = sphi %s1196_s20, %s1486_s20   ;;  %s1138_s19 = sphi %s1194_s19, %s1485_s19   ;;  %s1134_s18 = sphi %s1192_s18, %s1484_s18  }
   0x7   : > { %p42_p0 = scmp.ne.s32.totalorder %s1138_s19, %s1134_s18  ;;  %p1469_p1 = scmp.eq.s32.totalorder %s1213_s22, 0 }
   0x8   : > { %p156_p3 = scmp.eq.s32.totalorder %s792_s23, 3  ;;  %p793_p5 = scmp.ge.s32.totalorder %s1146_s21, 1 }
   0x9   : > { %p1222_p4 = por %p1469_p1, %p42_p0  ;;  %p163_p7 = scmp.lt.s32.totalorder %s1146_s21, 5 }
   0xa   : > { %p1227_p6 = por %p156_p3, %p42_p0  ;;  %s1148_s27 = smov [#allocation5]  }
   0xb   : > { %s1472_s24 = scalar_select %p1222_p4, 1, 0 }
   0xc   : > { %s1473_s25 = scalar_select %p1227_p6, 1, 0 }
   0xd   : > { %p1232_p8 = pnand %p793_p5, %p163_p7  ;;  %s175_s28 = sshll.u32 %s1148_s27, 4  ;;  %s176_s28 = int_to_ptr.vmem [resolvable:$true] %s175_s28 }
   0xe   : > { %s1149_s30 = smov [#allocation7]   ;;  %s990_s9 = scalar_lea.hbm %s1464_s1, 2048 }
   0xf   : > { %s1474_s26 = scalar_select %p1232_p8, 1, 0 }
  0x10   : > { %p885_p9 = pneg %p1232_p8  ;;  %s191_s6 = sshll.u32 %s1149_s30, 4  ;;  %s1244_s6 = int_to_ptr.vmem [resolvable:$true] %s191_s6 }
  0x11   : > { %p991_p11 = scmp.ne.s32.totalorder %s1464_s1, %s990_s9  ;;  %p997_p3 = scmp.lt.u32.totalorder %s990_s9, %s1464_s1 }
  0x12   : > { %p1240_p10 = pnand %p885_p9, %p1469_p1 }
  0x14   : > { %p992_p12 = pneg %p1240_p10 }
  0x16   : > { %p993_p13 = pnand %p992_p12, %p991_p11 }
  0x18   : > { %p994_p0 = pneg %p993_p13 }
  0x1a   : > { %p999_p5 = pnand %p997_p3, %p994_p0 }
  0x1c   : > { %1002 = shalt.err (!%p999_p5)
}
  0x1d   : > { %s1003_s14 = scalar_lea.vmem %s176_s28, 2048  ;;  %p1011_p2 = scmp.lt.s32.totalorder %s176_s28, %s176_s28 }
  0x1e   : > { %p1004_p7 = scmp.ne.s32.totalorder %s176_s28, %s1003_s14  ;;  %p1012_p6 = scmp.lt.s32.totalorder %s1003_s14, %s1003_s14 }
  0x20   : > { %p1006_p9 = pnand %p1004_p7, %p992_p12  ;;  %p1013_p4 = por %p1012_p6, %p1011_p2 }
  0x22   : > { %p1007_p1 = pneg %p1006_p9 }
  0x24   : > { %p1014_p8 = pnand %p1013_p4, %p1007_p1 }
  0x26   : > { %1017 = shalt.err (!%p1014_p8)
}
  0x27   : > { %s1150_s15 = smov 128   ;;  %s1151_s16 = smov 8  }
  0x28   : > { %888 = dma.hbm_to_vmem [thread:$0]  (!%p1240_p10), %s1464_s1, 2048, %s176_s28, [#allocation6], %s1150_s15, %s1150_s15, %s1151_s16  }
  0x29   : > { %s1018_s7 = scalar_lea.hbm %s1466_s3, 2048 }
  0x2a   : > { %p1019_p1 = scmp.ne.s32.totalorder %s1466_s3, %s1018_s7  ;;  %p1025_p6 = scmp.lt.u32.totalorder %s1018_s7, %s1466_s3 }
  0x2c   : > { %p1021_p2 = pnand %p1019_p1, %p992_p12 }
  0x2e   : > { %p1022_p4 = pneg %p1021_p2 }
  0x30   : > { %p1027_p8 = pnand %p1025_p6, %p1022_p4 }
  0x32   : > { %1030 = shalt.err (!%p1027_p8)
}
  0x33   : > { %s1031_s28 = scalar_lea.vmem %s1244_s6, 2048  ;;  %p1039_p3 = scmp.lt.s32.totalorder %s1244_s6, %s1244_s6 }
  0x34   : > { %p1032_p11 = scmp.ne.s32.totalorder %s1244_s6, %s1031_s28  ;;  %p1040_p5 = scmp.lt.s32.totalorder %s1031_s28, %s1031_s28 }
  0x36   : > { %p1034_p13 = pnand %p1032_p11, %p992_p12  ;;  %p1041_p7 = por %p1040_p5, %p1039_p3 }
  0x38   : > { %p1035_p0 = pneg %p1034_p13 }
  0x3a   : > { %p1042_p9 = pnand %p1041_p7, %p1035_p0 }
  0x3c   : > { %1045 = shalt.err (!%p1042_p9)
}
  0x3d   : > { %s1152_s12 = smov 64   ;;  %s1153_s13 = smov 4  }
  0x3e   : > { %891 = dma.hbm_to_vmem [thread:$0]  (!%p1240_p10), %s1466_s3, 2048, %s1244_s6, [#allocation6], %s1152_s12, %s1152_s12, %s1153_s13  }
  0x3f   : > { %s1297_s23 = sadd.s32 1, %s1146_s21   ;;  %s29_s30 = sadd.s32 1, %s1142_s20 }
  0x40   : > { %s26_s27 = ssub.s32 %s1146_s21, %s1297_s23  ;;  %p36_p1 = scmp.ne.s32.totalorder %s1142_s20, %s1138_s19 }
  0x41   : > { %p27_p12 = scmp.eq.s32.totalorder %s26_s27, 0  ;;  %p37_p2 = scmp.eq.s32.totalorder %s1146_s21, 0 }
  0x42   : > { %p1476_p6 = scmp.eq.s32.totalorder %s1213_s22, 3  ;;  %p902_p11 = scmp.lt.s32.totalorder %s1146_s21, 4 }
  0x43   : > { %s1306_s7 = scalar_select %p27_p12, %s1142_s20, %s29_s30  }
  0x44   : > { %p38_p4 = por %p37_p2, %p36_p1  ;;  %p1310_p8 = por %p1476_p6, %p36_p1 }
  0x45   : > { %s208_s29 = sand.u32 1, %s1142_s20   ;;  %s843_s6 = sshll.u32 %s1146_s21, 9 }
  0x46   : > { %s797_s9 = sshll.u32 %s208_s29, 5  ;;  %s1320_s28 = scalar_lea.hbm %s1463_s0, %s843_s6 }
  0x47   : > { %s212_s12 = scalar_lea.vmem [#allocation2], %s797_s9  ;;  %p1324_p10 = pnand %p902_p11, %p38_p4 }
  0x48   : > { %s219_s13 = sshll.u32 %s212_s12, 4  ;;  %s1328_s17 = scalar_lea.sflag [#allocation3], %s208_s29  ;;  %s1322_s13 = int_to_ptr.vmem [resolvable:$true] %s219_s13 }
  0x49   : > { %s1046_s27 = scalar_lea.hbm %s1320_s28, 512  ;;  %p1048_p0 = pneg %p1324_p10 }
  0x4a   : > { %p1047_p13 = scmp.ne.s32.totalorder %s1320_s28, %s1046_s27  ;;  %s1051_s6 = scalar_lea.hbm %s1463_s0, 2048 }
  0x4b   : > { %p1052_p7 = scmp.lt.u32.totalorder %s1320_s28, %s1463_s0  ;;  %p1053_p9 = scmp.lt.u32.totalorder %s1051_s6, %s1046_s27 }
  0x4c   : > { %p1049_p3 = pnand %p1048_p0, %p1047_p13  ;;  %p1055_p1 = scmp.lt.u32.totalorder %s1046_s27, %s1320_s28 }
  0x4d   : > { %p1054_p12 = por %p1053_p9, %p1052_p7 }
  0x4e   : > { %p1050_p5 = pneg %p1049_p3 }
  0x4f   : > { %p1056_p2 = por %p1055_p1, %p1054_p12 }
  0x51   : > { %p1057_p4 = pnand %p1056_p2, %p1050_p5 }
  0x53   : > { %1060 = shalt.err (!%p1057_p4)
}
  0x54   : > { %s1061_s29 = scalar_lea.vmem %s1322_s13, 512  ;;  %s1154_s12 = smov [#allocation2]  }
  0x55   : > { %p1062_p6 = scmp.ne.s32.totalorder %s1322_s13, %s1061_s29  ;;  %s1066_s30 = sshll.u32 %s1154_s12, 4  ;;  %s1067_s30 = int_to_ptr.vmem [resolvable:$false] %s1066_s30 }
  0x56   : > { %s1068_s9 = scalar_lea.vmem %s1067_s30, 1024  ;;  %p1069_p3 = scmp.lt.s32.totalorder %s1322_s13, %s1067_s30 }
  0x57   : > { %p1064_p11 = pnand %p1062_p6, %p1048_p0  ;;  %p1070_p7 = scmp.lt.s32.totalorder %s1068_s9, %s1061_s29 }
  0x59   : > { %p1065_p13 = pneg %p1064_p11  ;;  %p1071_p9 = por %p1070_p7, %p1069_p3 }
  0x5b   : > { %p1072_p12 = pnand %p1071_p9, %p1065_p13 }
  0x5d   : > { %1075 = shalt.err (!%p1072_p12)
}
  0x5e   : > { %895 = dma.hbm_to_vmem [thread:$0]  (!%p1324_p10), %s1320_s28, 512, %s1322_s13, %s1328_s17, %s1150_s15, %s1150_s15, %s1151_s16  }
  0x5f   : > { %p1479_p0 = scmp.ne.s32.totalorder %s1474_s26, 0 }
  0x60   : > { %s1362_s27 = sand.u32 (!%p1479_p0), 1, %s1138_s19   ;;  %p1480_p5 = scmp.ne.s32.totalorder (!%p1479_p0), %s1472_s24, 0 }
  0x61   : > { %231 = sbr.rel (%p1479_p0) target bundleno = 710 (0x2c6), region = 40  ;;  %s801_s6 = sshll.u32 (!%p1479_p0), %s1362_s27, 5 }
  0x62   : > { %s234_s10 = scalar_lea.sflag (!%p1479_p0), [#allocation3], %s1362_s27  ;;  %s237_s14 = scalar_lea.vmem (!%p1479_p0), [#allocation2], %s801_s6 }
  0x68   : > { %1121 = dma.done.wait (%p1480_p5), %s234_s10, 512  }
  0x69   : > { %1123 = vsyncadd (%p1480_p5), %s234_s10, 4294966784  ;;  %p1481_p10 = scmp.eq.s32.totalorder %s1213_s22, 0 }
  0x6b   : > { %1125 = dma.done.wait (%p1481_p10), [#allocation6], 4096   ;;  %p1482_p1 = pmov %p1481_p10 }
  0x6c   : > { %v1376_v0 = vld [vmem:[%s237_s14] sm:$0xff]  ;;  %s1155_s26 = smov 2   ;;  %s1156_s15 = smov 127   ;;  %v1381_v1 = vld [vmem:[%s237_s14 + $0x8] sm:$0xff]  ;;  %v953_v4 = vld [vmem:[#allocation5 + $0x14] ss:$8 sps:$4 sm:$0xff]  }
  0x6d   : > { %1127 = vsyncadd (%p1482_p1), [#allocation6], 4294963200  ;;  %287 = vrot.lane.b32.xlu1 %v1376_v0, %s1155_s26  ;;  %279 = vrot.lane.b32.xlu0 %v1376_v0, %s1156_s15  ;;  %v950_v2 = vld [vmem:[#allocation5 + $0x4] ss:$8 sps:$4 sm:$0xff]   ;;  %v952_v3 = vld [vmem:[#allocation5] ss:$8 sps:$4 sm:$0xff]  }
  0x6e   : > { %433 = vmatprep.subr.bf16.mxu0 %v950_v2  ;;  %v955_v5 = vld [vmem:[#allocation5 + $0x10] ss:$8 sps:$4 sm:$0xff]   ;;  %v1157_v6 = vmov 0   ;;  %v956_v7 = vld [vmem:[#allocation5 + $0x24] ss:$8 sps:$4 sm:$0xff]   ;;  %s1158_s24 = smov 1  }
  0x6f   : > { %434 = vmatpush1.bf16.msra.mxu0 %v952_v3  ;;  %465 = vmatprep.mubr.bf16.mxu0 %v1157_v6  ;;  %v1389_v8 = vld [vmem:[%s237_s14 + $0x18] sm:$0xff]  ;;  %v1391_v9 = vld [vmem:[%s237_s14 + $0x10] sm:$0xff]  ;;  %v958_v10 = vld [vmem:[#allocation5 + $0x20] ss:$8 sps:$4 sm:$0xff]   ;;  %s271_s11 = scalar_lea.vmem [#allocation8], %s801_s6  ;;  %s844_s12 = sshll.u32 %s1213_s22, 9 }
  0x70   : > { %435 = vmatprep.subr.bf16.mxu0 %v953_v4  ;;  %v959_v11 = vld [vmem:[#allocation5 + $0x34] ss:$8 sps:$4 sm:$0xff]   ;;  %v961_v12 = vld [vmem:[#allocation5 + $0x30] ss:$8 sps:$4 sm:$0xff]   ;;  %v962_v13 = vld [vmem:[#allocation5 + $0x44] ss:$8 sps:$4 sm:$0xff]   ;;  %s1420_s6 = scalar_lea.hbm %s1468_s5, %s844_s12 }
  0x71   : > { %289 = vrot.lane.b32.xlu1 %v1381_v1, %s1155_s26  ;;  %281 = vrot.lane.b32.xlu0 %v1381_v1, %s1156_s15  ;;  %v964_v14 = vld [vmem:[#allocation5 + $0x40] ss:$8 sps:$4 sm:$0xff]   ;;  %v965_v17 = vld [vmem:[#allocation5 + $0x54] ss:$8 sps:$4 sm:$0xff]   ;;  %v967_v19 = vld [vmem:[#allocation5 + $0x50] ss:$8 sps:$4 sm:$0xff]  }
  0x72   : > { %v974_v15 = vld [vmem:[#allocation7 + $0x40] sm:$0xff]   ;;  %v976_v18 = vld [vmem:[#allocation7 + $0x48] sm:$0xff]   ;;  %v978_v22 = vld [vmem:[#allocation7 + $0x50] sm:$0xff]   ;;  %s700_s29 = sshll.u32 %s271_s11, 4  ;;  %s687_s10 = scalar_lea.sflag [#allocation4], %s1362_s27  ;;  %s1415_s29 = int_to_ptr.vmem [resolvable:$true] %s700_s29 }
  0x73   : > { %436 = vmatpush1.bf16.msra.mxu0 %v955_v5  ;;  %v975_v16 = vld [vmem:[#allocation7] sm:$0xff]   ;;  %845 = vmatprep.subr.bf16.mxu1 %v974_v15  ;;  %v977_v21 = vld [vmem:[#allocation7 + $0x8] sm:$0xff]   ;;  %v979_v24 = vld [vmem:[#allocation7 + $0x10] sm:$0xff]   ;;  %s1076_s14 = scalar_lea.vmem %s1415_s29, 512  ;;  %s1159_s22 = smov [#allocation8]  }
  0x74   : > { %437 = vmatprep.subr.bf16.mxu0 %v956_v7  ;;  %v968_v20 = vld [vmem:[#allocation5 + $0x64] ss:$8 sps:$4 sm:$0xff]   ;;  %846 = vmatpush3.bf16.msra.mxu1 %v975_v16  ;;  %v970_v23 = vld [vmem:[#allocation5 + $0x60] ss:$8 sps:$4 sm:$0xff]   ;;  %v971_v25 = vld [vmem:[#allocation5 + $0x74] ss:$8 sps:$4 sm:$0xff]   ;;  %v343_v7 = vlaneseq  ;;  %p1077_p2 = scmp.ne.s32.totalorder %s1415_s29, %s1076_s14 }
  0x75   : > { %301 = vrot.lane.b32.xlu1 %v1381_v1, %s1158_s24  ;;  %299 = vrot.lane.b32.xlu0 %v1376_v0, %s1158_s24  ;;  %v980_v26 = vld [vmem:[#allocation7 + $0x58] sm:$0xff]   ;;  %v982_v29 = vld [vmem:[#allocation7 + $0x60] sm:$0xff]   ;;  %v984_v31 = vld [vmem:[#allocation7 + $0x68] sm:$0xff]  }
  0x76   : > { %847 = vmatprep.subr.bf16.mxu1 %v976_v18  ;;  %v973_v27 = vld [vmem:[#allocation5 + $0x70] ss:$8 sps:$4 sm:$0xff]   ;;  %v983_v30 = vld [vmem:[#allocation7 + $0x20] sm:$0xff]   ;;  %v985_v2 = vld [vmem:[#allocation7 + $0x28] sm:$0xff]   ;;  %p1078_p4 = pnand %p1077_p2, %p1310_p8 }
  0x77   : > { %438 = vmatpush1.bf16.msra.mxu0 %v958_v10  ;;  %v981_v28 = vld [vmem:[#allocation7 + $0x18] sm:$0xff]   ;;  %v986_v3 = vld [vmem:[#allocation7 + $0x70] sm:$0xff]  }
  0x78   : > { %439 = vmatprep.subr.bf16.mxu0 %v959_v11  ;;  %848 = vmatpush3.bf16.msra.mxu1 %v977_v21  ;;  %v987_v4 = vld [vmem:[#allocation7 + $0x30] sm:$0xff]   ;;  %v988_v5 = vld [vmem:[#allocation7 + $0x78] sm:$0xff]   ;;  %p1079_p6 = pneg %p1078_p4 }
  0x79   : > { %285 = vrot.lane.b32.xlu1 %v1389_v8, %s1156_s15  ;;  %283 = vrot.lane.b32.xlu0 %v1391_v9, %s1156_s15 }
  0x7a   : > { %849 = vmatprep.subr.bf16.mxu1 %v978_v22 }
  0x7b   : > { %440 = vmatpush1.bf16.msra.mxu0 %v961_v12 }
  0x7c   : > { %441 = vmatprep.subr.bf16.mxu0 %v962_v13  ;;  %850 = vmatpush3.bf16.msra.mxu1 %v979_v24 }
  0x7d   : > { %293 = vrot.lane.b32.xlu1 %v1389_v8, %s1155_s26  ;;  %291 = vrot.lane.b32.xlu0 %v1391_v9, %s1155_s26  ;;  %s1080_s26 = sshll.u32 %s1159_s22, 4  ;;  %s1081_s26 = int_to_ptr.vmem [resolvable:$false] %s1080_s26 }
  0x7e   : > { %851 = vmatprep.subr.bf16.mxu1 %v980_v26  ;;  %s1082_s15 = scalar_lea.vmem %s1081_s26, 1024  ;;  %p1083_p11 = scmp.lt.s32.totalorder %s1415_s29, %s1081_s26 }
  0x7f   : > { %442 = vmatpush1.bf16.msra.mxu0 %v964_v14  ;;  %p1084_p13 = scmp.lt.s32.totalorder %s1082_s15, %s1076_s14 }
  0x80   : > { %443 = vmatprep.subr.bf16.mxu0 %v965_v17  ;;  %852 = vmatpush3.bf16.msra.mxu1 %v981_v28 }
  0x81   : > { %305 = vrot.lane.b32.xlu1 %v1389_v8, %s1158_s24  ;;  %303 = vrot.lane.b32.xlu0 %v1391_v9, %s1158_s24  ;;  %p1085_p3 = por %p1084_p13, %p1083_p11 }
  0x82   : > { %853 = vmatprep.subr.bf16.mxu1 %v982_v29 }
  0x83   : > { %444 = vmatpush1.bf16.msra.mxu0 %v967_v19  ;;  %p1086_p7 = pnand %p1085_p3, %p1079_p6 }
  0x84   : > { %445 = vmatprep.subr.bf16.mxu0 %v968_v20  ;;  %854 = vmatpush3.bf16.msra.mxu1 %v983_v30 }
  0x85   : > { %855 = vmatprep.subr.bf16.mxu1 %v984_v31 }
  0x87   : > { %446 = vmatpush1.bf16.msra.mxu0 %v970_v23 }
  0x88   : > { %447 = vmatprep.subr.bf16.mxu0 %v971_v25  ;;  %856 = vmatpush3.bf16.msra.mxu1 %v985_v2 }
  0x89   : > { %857 = vmatprep.subr.bf16.mxu1 %v986_v3 }
  0x8b   : > { %448 = vmatpush1.bf16.msra.mxu0 %v973_v27 }
  0x8c   : > { %858 = vmatpush3.bf16.msra.mxu1 %v987_v4 }
  0x8d   : > { %859 = vmatprep.subr.bf16.mxu1 %v988_v5 }
  0xdf   : > { %v288_v32 = vpop.permute.xlu1 %287  ;;  %v280_v33 = vpop.permute.xlu0 %279 }
  0xe0   : > { %v295_v36 = vsub.f32 %v280_v33, %v288_v32 }
  0xe3   : > { %v290_v34 = vpop.permute.xlu1 %289  ;;  %v282_v35 = vpop.permute.xlu0 %281 }
  0xe4   : > { %v296_v37 = vsub.f32 %v282_v35, %v290_v34 }
  0xe7   : > { %v302_v38 = vpop.permute.xlu1 %301  ;;  %v300_v39 = vpop.permute.xlu0 %299 }
  0xe8   : > { %v308_v40 = vmul.f32 %v302_v38, %v296_v37  ;;  %v307_v41 = vmul.f32 %v300_v39, %v295_v36 }
  0xea   : > { %v312_v42 = vsub.f32 %v308_v40, %v1381_v1  ;;  %v311_v43 = vsub.f32 %v307_v41, %v1376_v0 }
  0xeb   : > { %v286_v44 = vpop.permute.xlu1 %285  ;;  %v284_v45 = vpop.permute.xlu0 %283 }
  0xec   : > { %v316_v46 = vadd.f32 8.0, %v312_v42  ;;  %v315_v47 = vadd.f32 8.0, %v311_v43  ;;  %v821_v43 = vld [vmem:[%s1467_s4] ss:$0 sm:$0xff] }
  0xee   : > { %v320_v48 = vmax.f32 %v316_v46, 0.0  ;;  %v319_v49 = vmax.f32 %v315_v47, 0.0 }
  0xef   : > { %v294_v50 = vpop.permute.xlu1 %293  ;;  %v292_v51 = vpop.permute.xlu0 %291 }
  0xf0   : > { %v340_v52 = vpack.c.bf16 %v320_v48, %v319_v49  ;;  %v298_v53 = vsub.f32 %v286_v44, %v294_v50  ;;  %v297_v54 = vsub.f32 %v284_v45, %v292_v51 }
  0xf2   : > { %466 = vmatmul.mubr.bf16.vlgmr.msra.gmra.mrb[0].mxu0 %v340_v52 }
  0xf3   : > { %v306_v55 = vpop.permute.xlu1 %305  ;;  %v304_v56 = vpop.permute.xlu0 %303  ;;  %475 = vmatprep.mubr.bf16.mxu0 %v1157_v6  ;;  %v989_v6 = vld [vmem:[#allocation7 + $0x38] sm:$0xff]  }
  0xf4   : > { %v310_v57 = vmul.f32 %v306_v55, %v298_v53  ;;  %v309_v58 = vmul.f32 %v304_v56, %v297_v54  ;;  %860 = vmatpush3.bf16.msra.mxu1 %v989_v6 }
  0xf6   : > { %v314_v59 = vsub.f32 %v310_v57, %v1389_v8  ;;  %v313_v60 = vsub.f32 %v309_v58, %v1391_v9  ;;  %v344_v8 = vshrl.u32 %v343_v7, 7  ;;  %v339_v9 = vld [vmem:[%s1465_s2] sm:$0x3] }
  0xf8   : > { %v318_v61 = vadd.f32 8.0, %v314_v59  ;;  %v317_v62 = vadd.f32 8.0, %v313_v60  ;;  %v345_v10 = vsub.s32 0, %v344_v8  ;;  %v349_v11 = vsub.s32 1, %v344_v8 }
  0xfa   : > { %v322_v63 = vmax.f32 %v318_v61, 0.0  ;;  %v321_v0 = vmax.f32 %v317_v62, 0.0  ;;  %v346_v12 = vrot.slane %v339_v9, %v345_v10  ;;  %v350_v13 = vrot.slane %v339_v9, %v349_v11 }
  0xfc   : > { %v341_v1 = vpack.c.bf16 %v322_v63, %v321_v0 }
  0xfe   : > { %476 = vmatmul.mubr.bf16.gmra.mrb[4].mxu0 %v341_v1 }
 0x1c5   : > { %v467_v14 = vpop.f32.mrb[0].mxu0 }
 0x1c6   : > { %v468_v15 = vadd.f32 %v467_v14, %v346_v12  ;;  %v469_v16 = vpop.f32.mrb[1].mxu0 }
 0x1c7   : > { %v470_v17 = vadd.f32 %v469_v16, %v350_v13  ;;  %v471_v18 = vpop.f32.mrb[2].mxu0 }
 0x1c8   : > { %v472_v19 = vadd.f32 %v471_v18, %v346_v12  ;;  %v473_v20 = vpop.f32.mrb[3].mxu0  ;;  %v486_v22 = vmax.f32 %v468_v15, 0.0 }
 0x1c9   : > { %v474_v21 = vadd.f32 %v473_v20, %v350_v13  ;;  %v487_v24 = vmax.f32 %v470_v17, 0.0 }
 0x1ca   : > { %v488_v23 = vmax.f32 %v472_v19, 0.0 }
 0x1cb   : > { %v489_v25 = vmax.f32 %v474_v21, 0.0 }
 0x1cc   : > { %v527_v26 = vpack.c.bf16 %v488_v23, %v486_v22 }
 0x1cd   : > { %v528_v27 = vpack.c.bf16 %v489_v25, %v487_v24 }
 0x1cf   : > { %665 = vmatprep.mubr.bf16.mxu1 %v528_v27 }
 0x1d0   : > { %666 = vmatmul.mubr.bf16.vlgmr.msra.gmra.mrb[0].mxu1 %v527_v26 }
 0x1d1   : > { %v477_v28 = vpop.f32.mrb[4].mxu0 }
 0x1d2   : > { %v478_v29 = vadd.f32 %v477_v28, %v346_v12  ;;  %v479_v30 = vpop.f32.mrb[5].mxu0 }
 0x1d3   : > { %v480_v31 = vadd.f32 %v479_v30, %v350_v13  ;;  %v481_v32 = vpop.f32.mrb[6].mxu0 }
 0x1d4   : > { %v482_v33 = vadd.f32 %v481_v32, %v346_v12  ;;  %v483_v34 = vpop.f32.mrb[7].mxu0  ;;  %v490_v36 = vmax.f32 %v478_v29, 0.0 }
 0x1d5   : > { %v484_v35 = vadd.f32 %v483_v34, %v350_v13  ;;  %v491_v38 = vmax.f32 %v480_v31, 0.0 }
 0x1d6   : > { %v492_v37 = vmax.f32 %v482_v33, 0.0 }
 0x1d7   : > { %v493_v39 = vmax.f32 %v484_v35, 0.0 }
 0x1d8   : > { %v529_v40 = vpack.c.bf16 %v492_v37, %v490_v36 }
 0x1d9   : > { %v530_v41 = vpack.c.bf16 %v493_v39, %v491_v38 }
 0x1db   : > { %673 = vmatprep.mubr.bf16.mxu1 %v530_v41 }
 0x1dc   : > { %674 = vmatmul.mubr.bf16.gmra.mrb[4].mxu1 %v529_v40 }
 0x2a3   : > { %v861_v42 = vpop.f32.mrb[0].mxu1 }
 0x2a4   : > { %v862_v44 = vpop.f32.mrb[1].mxu1 }
 0x2a5   : > { %v863_v45 = vadd.f32 %v862_v44, %v861_v42  ;;  %v864_v46 = vpop.f32.mrb[2].mxu1 }
 0x2a6   : > { %v865_v47 = vpop.f32.mrb[3].mxu1 }
 0x2a7   : > { %v668_v48 = vadd.f32 %v863_v45, %v821_v43  ;;  %v866_v49 = vadd.f32 %v865_v47, %v864_v46 }
 0x2a9   : > { %682 = vst [vmem:[%s271_s11] sm:$0xff] %v668_v48  ;;  %v671_v50 = vadd.f32 %v866_v49, %v821_v43 }
 0x2ab   : > { %683 = vst [vmem:[%s271_s11 + $0x8] sm:$0xff] %v671_v50 }
 0x2af   : > { %v867_v51 = vpop.f32.mrb[4].mxu1 }
 0x2b0   : > { %v868_v52 = vpop.f32.mrb[5].mxu1 }
 0x2b1   : > { %v869_v53 = vadd.f32 %v868_v52, %v867_v51  ;;  %v870_v54 = vpop.f32.mrb[6].mxu1 }
 0x2b2   : > { %v871_v55 = vpop.f32.mrb[7].mxu1 }
 0x2b3   : > { %v676_v56 = vadd.f32 %v869_v53, %v821_v43  ;;  %v872_v57 = vadd.f32 %v871_v55, %v870_v54 }
 0x2b5   : > { %684 = vst [vmem:[%s271_s11 + $0x10] sm:$0xff] %v676_v56  ;;  %v679_v58 = vadd.f32 %v872_v57, %v821_v43 }
 0x2b7   : > { %685 = vst [vmem:[%s271_s11 + $0x18] sm:$0xff] %v679_v58 }
 0x2b8   : > { %1089 = shalt.err (!%p1086_p7)
}
 0x2b9   : > { %s1090_s24 = scalar_lea.hbm %s1420_s6, 512  ;;  %s1094_s13 = scalar_lea.hbm %s1468_s5, 2048 }
 0x2ba   : > { %p1091_p9 = scmp.ne.s32.totalorder %s1420_s6, %s1090_s24  ;;  %p1095_p5 = scmp.lt.u32.totalorder %s1420_s6, %s1468_s5 }
 0x2bb   : > { %p1096_p10 = scmp.lt.u32.totalorder %s1094_s13, %s1090_s24  ;;  %p1098_p2 = scmp.lt.u32.totalorder %s1090_s24, %s1420_s6 }
 0x2bc   : > { %p1092_p12 = pnand %p1091_p9, %p1310_p8 }
 0x2bd   : > { %p1097_p1 = por %p1096_p10, %p1095_p5 }
 0x2be   : > { %p1093_p0 = pneg %p1092_p12 }
 0x2bf   : > { %p1099_p4 = por %p1098_p2, %p1097_p1 }
 0x2c1   : > { %p1100_p6 = pnand %p1099_p4, %p1093_p0 }
 0x2c3   : > { %1103 = shalt.err (!%p1100_p6)
}
 0x2c4   : > { %s1160_s12 = smov 128   ;;  %s1161_s30 = smov 8  }
 0x2c5   : > { %883 = dma.vmem_to_hbm [thread:$0]  (%p1310_p8), %s1415_s29, 512, %s1420_s6, %s687_s10, %s1160_s12, %s1160_s12, %s1161_s30  }
 0x2c6 PF: > { %p905_p11 = scmp.ge.s32.totalorder %s1146_s21, 2  ;;  %s715_s9 = sand.u32 1, %s1134_s18  }
 0x2c7   : > { %p1483_p13 = scmp.ne.s32.totalorder %s1473_s25, 0  ;;  %s716_s14 = scalar_lea.sflag [#allocation4], %s715_s9 }
 0x2c9   : > { %p897_p3 = pnand %p905_p11, %p1483_p13 }
 0x2cb   : > { %1129 = dma.done.wait (!%p897_p3), %s716_s14, 512  }
 0x2cc   : > { %1131 = vsyncadd (!%p897_p3), %s716_s14, 4294966784  ;;  %p19_p7 = scmp.ge.s32.totalorder %s1297_s23, 6   ;;  %s1484_s18 = smov %s1138_s19 }
 0x2cd   : > { %s1485_s19 = smov %s1142_s20  ;;  %s1486_s20 = smov %s1306_s7 }
 0x2ce   : > { %s1487_s21 = smov %s1297_s23  ;;  %21 = sbr.rel (!%p19_p7) target bundleno = 6 (0x6), region = 93 }
 0x2d5   :  { %721 = vsyncpa [#allocation3], 1 }
 0x2d6   :  { %723 = vsyncpa [#allocation3 + $0x1], 1 }
 0x2d7   :  { %724 = vsyncpa [#allocation6], 1 }
 0x2d8   :  { %725 = vsyncpa [#allocation4], 1 }
 0x2d9   :  { %727 = vsyncpa [#allocation4 + $0x1], 1 }

// kernel: tpu_custom_call.1
= control target key start
LH: loop header
LB: loop body
LE: loop exit
PB: predicated region body
PF: predicated region fallthrough
CT: control target
= control target key end

     0   :  { %10 = vsyncpa [#allocation3], 0  ;;  %s1463_s0 = inlined_call_operand.hbm [shape: f32[128,128], index: 0, kind: input, shape index: {}]   ;;  %s1464_s1 = inlined_call_operand.hbm [shape: bf16[128,256], index: 1, kind: input, shape index: {}]   ;;  %s1465_s2 = inlined_call_operand.vmem [shape: f32[1,256], index: 2, kind: input, shape index: {}]   ;;  %s1466_s3 = inlined_call_operand.hbm [shape: bf16[256,128], index: 3, kind: input, shape index: {}]   ;;  %s1467_s4 = inlined_call_operand.vmem [shape: f32[1,128], index: 4, kind: input, shape index: {}]   ;;  %s1468_s5 = inlined_call_operand.hbm [shape: f32[128,128], index: 5, kind: output, shape index: {}]  }
   0x1   :  { %12 = vsyncpa [#allocation3 + $0x1], 0 }
   0x2   :  { %13 = vsyncpa [#allocation6], 0 }
   0x3   :  { %14 = vsyncpa [#allocation4], 0 }
   0x4   :  { %16 = vsyncpa [#allocation4 + $0x1], 0  ;;  %s1192_s18 = smov 0   ;;  %s1194_s19 = smov 0  }
   0x5   :  { %s1196_s20 = smov 0   ;;  %s1198_s21 = smov 0  }
   0x6 LB: > { %s1213_s22 = sadd.s32 4294967295, %s1146_s21   ;;  %s792_s23 = sadd.s32 4294967294, %s1146_s21   ;;  %s1146_s21 = sphi %s1198_s21, %s1487_s21   ;;  %s1142_s20 = sphi %s1196_s20, %s1486_s20   ;;  %s1138_s19 = sphi %s1194_s19, %s1485_s19   ;;  %s1134_s18 = sphi %s1192_s18, %s1484_s18  }
   0x7   : > { %p42_p0 = scmp.ne.s32.totalorder %s1138_s19, %s1134_s18  ;;  %p1469_p1 = scmp.eq.s32.totalorder %s1213_s22, 0 }
   0x8   : > { %p156_p3 = scmp.eq.s32.totalorder %s792_s23, 3  ;;  %p793_p5 = scmp.ge.s32.totalorder %s1146_s21, 1 }
   0x9   : > { %p1222_p4 = por %p1469_p1, %p42_p0  ;;  %p163_p7 = scmp.lt.s32.totalorder %s1146_s21, 5 }
   0xa   : > { %p1227_p6 = por %p156_p3, %p42_p0  ;;  %s1148_s27 = smov [#allocation5]  }
   0xb   : > { %s1472_s24 = scalar_select %p1222_p4, 1, 0 }
   0xc   : > { %s1473_s25 = scalar_select %p1227_p6, 1, 0 }
   0xd   : > { %p1232_p8 = pnand %p793_p5, %p163_p7  ;;  %s175_s28 = sshll.u32 %s1148_s27, 4  ;;  %s176_s28 = int_to_ptr.vmem [resolvable:$true] %s175_s28 }
   0xe   : > { %s1149_s30 = smov [#allocation7]   ;;  %s990_s9 = scalar_lea.hbm %s1464_s1, 2048 }
   0xf   : > { %s1474_s26 = scalar_select %p1232_p8, 1, 0 }
  0x10   : > { %p885_p9 = pneg %p1232_p8  ;;  %s191_s6 = sshll.u32 %s1149_s30, 4  ;;  %s1244_s6 = int_to_ptr.vmem [resolvable:$true] %s191_s6 }
  0x11   : > { %p991_p11 = scmp.ne.s32.totalorder %s1464_s1, %s990_s9  ;;  %p997_p3 = scmp.lt.u32.totalorder %s990_s9, %s1464_s1 }
  0x12   : > { %p1240_p10 = pnand %p885_p9, %p1469_p1 }
  0x14   : > { %p992_p12 = pneg %p1240_p10 }
  0x16   : > { %p993_p13 = pnand %p992_p12, %p991_p11 }
  0x18   : > { %p994_p0 = pneg %p993_p13 }
  0x1a   : > { %p999_p5 = pnand %p997_p3, %p994_p0 }
  0x1c   : > { %1002 = shalt.err (!%p999_p5)
}
  0x1d   : > { %s1003_s14 = scalar_lea.vmem %s176_s28, 2048  ;;  %p1011_p2 = scmp.lt.s32.totalorder %s176_s28, %s176_s28 }
  0x1e   : > { %p1004_p7 = scmp.ne.s32.totalorder %s176_s28, %s1003_s14  ;;  %p1012_p6 = scmp.lt.s32.totalorder %s1003_s14, %s1003_s14 }
  0x20   : > { %p1006_p9 = pnand %p1004_p7, %p992_p12  ;;  %p1013_p4 = por %p1012_p6, %p1011_p2 }
  0x22   : > { %p1007_p1 = pneg %p1006_p9 }
  0x24   : > { %p1014_p8 = pnand %p1013_p4, %p1007_p1 }
  0x26   : > { %1017 = shalt.err (!%p1014_p8)
}
  0x27   : > { %s1150_s15 = smov 128   ;;  %s1151_s16 = smov 8  }
  0x28   : > { %888 = dma.hbm_to_vmem [thread:$0]  (!%p1240_p10), %s1464_s1, 2048, %s176_s28, [#allocation6], %s1150_s15, %s1150_s15, %s1151_s16  }
  0x29   : > { %s1018_s7 = scalar_lea.hbm %s1466_s3, 2048 }
  0x2a   : > { %p1019_p1 = scmp.ne.s32.totalorder %s1466_s3, %s1018_s7  ;;  %p1025_p6 = scmp.lt.u32.totalorder %s1018_s7, %s1466_s3 }
  0x2c   : > { %p1021_p2 = pnand %p1019_p1, %p992_p12 }
  0x2e   : > { %p1022_p4 = pneg %p1021_p2 }
  0x30   : > { %p1027_p8 = pnand %p1025_p6, %p1022_p4 }
  0x32   : > { %1030 = shalt.err (!%p1027_p8)
}
  0x33   : > { %s1031_s28 = scalar_lea.vmem %s1244_s6, 2048  ;;  %p1039_p3 = scmp.lt.s32.totalorder %s1244_s6, %s1244_s6 }
  0x34   : > { %p1032_p11 = scmp.ne.s32.totalorder %s1244_s6, %s1031_s28  ;;  %p1040_p5 = scmp.lt.s32.totalorder %s1031_s28, %s1031_s28 }
  0x36   : > { %p1034_p13 = pnand %p1032_p11, %p992_p12  ;;  %p1041_p7 = por %p1040_p5, %p1039_p3 }
  0x38   : > { %p1035_p0 = pneg %p1034_p13 }
  0x3a   : > { %p1042_p9 = pnand %p1041_p7, %p1035_p0 }
  0x3c   : > { %1045 = shalt.err (!%p1042_p9)
}
  0x3d   : > { %s1152_s12 = smov 64   ;;  %s1153_s13 = smov 4  }
  0x3e   : > { %891 = dma.hbm_to_vmem [thread:$0]  (!%p1240_p10), %s1466_s3, 2048, %s1244_s6, [#allocation6], %s1152_s12, %s1152_s12, %s1153_s13  }
  0x3f   : > { %s1297_s23 = sadd.s32 1, %s1146_s21   ;;  %s29_s30 = sadd.s32 1, %s1142_s20 }
  0x40   : > { %s26_s27 = ssub.s32 %s1146_s21, %s1297_s23  ;;  %p36_p1 = scmp.ne.s32.totalorder %s1142_s20, %s1138_s19 }
  0x41   : > { %p27_p12 = scmp.eq.s32.totalorder %s26_s27, 0  ;;  %p37_p2 = scmp.eq.s32.totalorder %s1146_s21, 0 }
  0x42   : > { %p1476_p6 = scmp.eq.s32.totalorder %s1213_s22, 3  ;;  %p902_p11 = scmp.lt.s32.totalorder %s1146_s21, 4 }
  0x43   : > { %s1306_s7 = scalar_select %p27_p12, %s1142_s20, %s29_s30  }
  0x44   : > { %p38_p4 = por %p37_p2, %p36_p1  ;;  %p1310_p8 = por %p1476_p6, %p36_p1 }
  0x45   : > { %s208_s29 = sand.u32 1, %s1142_s20   ;;  %s843_s6 = sshll.u32 %s1146_s21, 9 }
  0x46   : > { %s797_s9 = sshll.u32 %s208_s29, 5  ;;  %s1320_s28 = scalar_lea.hbm %s1463_s0, %s843_s6 }
  0x47   : > { %s212_s12 = scalar_lea.vmem [#allocation2], %s797_s9  ;;  %p1324_p10 = pnand %p902_p11, %p38_p4 }
  0x48   : > { %s219_s13 = sshll.u32 %s212_s12, 4  ;;  %s1328_s17 = scalar_lea.sflag [#allocation3], %s208_s29  ;;  %s1322_s13 = int_to_ptr.vmem [resolvable:$true] %s219_s13 }
  0x49   : > { %s1046_s27 = scalar_lea.hbm %s1320_s28, 512  ;;  %p1048_p0 = pneg %p1324_p10 }
  0x4a   : > { %p1047_p13 = scmp.ne.s32.totalorder %s1320_s28, %s1046_s27  ;;  %s1051_s6 = scalar_lea.hbm %s1463_s0, 2048 }
  0x4b   : > { %p1052_p7 = scmp.lt.u32.totalorder %s1320_s28, %s1463_s0  ;;  %p1053_p9 = scmp.lt.u32.totalorder %s1051_s6, %s1046_s27 }
  0x4c   : > { %p1049_p3 = pnand %p1048_p0, %p1047_p13  ;;  %p1055_p1 = scmp.lt.u32.totalorder %s1046_s27, %s1320_s28 }
  0x4d   : > { %p1054_p12 = por %p1053_p9, %p1052_p7 }
  0x4e   : > { %p1050_p5 = pneg %p1049_p3 }
  0x4f   : > { %p1056_p2 = por %p1055_p1, %p1054_p12 }
  0x51   : > { %p1057_p4 = pnand %p1056_p2, %p1050_p5 }
  0x53   : > { %1060 = shalt.err (!%p1057_p4)
}
  0x54   : > { %s1061_s29 = scalar_lea.vmem %s1322_s13, 512  ;;  %s1154_s12 = smov [#allocation2]  }
  0x55   : > { %p1062_p6 = scmp.ne.s32.totalorder %s1322_s13, %s1061_s29  ;;  %s1066_s30 = sshll.u32 %s1154_s12, 4  ;;  %s1067_s30 = int_to_ptr.vmem [resolvable:$false] %s1066_s30 }
  0x56   : > { %s1068_s9 = scalar_lea.vmem %s1067_s30, 1024  ;;  %p1069_p3 = scmp.lt.s32.totalorder %s1322_s13, %s1067_s30 }
  0x57   : > { %p1064_p11 = pnand %p1062_p6, %p1048_p0  ;;  %p1070_p7 = scmp.lt.s32.totalorder %s1068_s9, %s1061_s29 }
  0x59   : > { %p1065_p13 = pneg %p1064_p11  ;;  %p1071_p9 = por %p1070_p7, %p1069_p3 }
  0x5b   : > { %p1072_p12 = pnand %p1071_p9, %p1065_p13 }
  0x5d   : > { %1075 = shalt.err (!%p1072_p12)
}
  0x5e   : > { %895 = dma.hbm_to_vmem [thread:$0]  (!%p1324_p10), %s1320_s28, 512, %s1322_s13, %s1328_s17, %s1150_s15, %s1150_s15, %s1151_s16  }
  0x5f   : > { %p1479_p0 = scmp.ne.s32.totalorder %s1474_s26, 0 }
  0x60   : > { %s1362_s27 = sand.u32 (!%p1479_p0), 1, %s1138_s19   ;;  %p1480_p5 = scmp.ne.s32.totalorder (!%p1479_p0), %s1472_s24, 0 }
  0x61   : > { %231 = sbr.rel (%p1479_p0) target bundleno = 710 (0x2c6), region = 40  ;;  %s801_s6 = sshll.u32 (!%p1479_p0), %s1362_s27, 5 }
  0x62   : > { %s234_s10 = scalar_lea.sflag (!%p1479_p0), [#allocation3], %s1362_s27  ;;  %s237_s14 = scalar_lea.vmem (!%p1479_p0), [#allocation2], %s801_s6 }
  0x68   : > { %1121 = dma.done.wait (%p1480_p5), %s234_s10, 512  }
  0x69   : > { %1123 = vsyncadd (%p1480_p5), %s234_s10, 4294966784  ;;  %p1481_p10 = scmp.eq.s32.totalorder %s1213_s22, 0 }
  0x6b   : > { %1125 = dma.done.wait (%p1481_p10), [#allocation6], 4096   ;;  %p1482_p1 = pmov %p1481_p10 }
  0x6c   : > { %v1376_v0 = vld [vmem:[%s237_s14] sm:$0xff]  ;;  %s1155_s26 = smov 2   ;;  %s1156_s15 = smov 127   ;;  %v1381_v1 = vld [vmem:[%s237_s14 + $0x8] sm:$0xff]  ;;  %v953_v4 = vld [vmem:[#allocation5 + $0x14] ss:$8 sps:$4 sm:$0xff]  }
  0x6d   : > { %1127 = vsyncadd (%p1482_p1), [#allocation6], 4294963200  ;;  %287 = vrot.lane.b32.xlu1 %v1376_v0, %s1155_s26  ;;  %279 = vrot.lane.b32.xlu0 %v1376_v0, %s1156_s15  ;;  %v950_v2 = vld [vmem:[#allocation5 + $0x4] ss:$8 sps:$4 sm:$0xff]   ;;  %v952_v3 = vld [vmem:[#allocation5] ss:$8 sps:$4 sm:$0xff]  }
  0x6e   : > { %433 = vmatprep.subr.bf16.mxu0 %v950_v2  ;;  %v955_v5 = vld [vmem:[#allocation5 + $0x10] ss:$8 sps:$4 sm:$0xff]   ;;  %v1157_v6 = vmov 0   ;;  %v956_v7 = vld [vmem:[#allocation5 + $0x24] ss:$8 sps:$4 sm:$0xff]   ;;  %s1158_s24 = smov 1  }
  0x6f   : > { %434 = vmatpush1.bf16.msra.mxu0 %v952_v3  ;;  %465 = vmatprep.mubr.bf16.mxu0 %v1157_v6  ;;  %v1389_v8 = vld [vmem:[%s237_s14 + $0x18] sm:$0xff]  ;;  %v1391_v9 = vld [vmem:[%s237_s14 + $0x10] sm:$0xff]  ;;  %v958_v10 = vld [vmem:[#allocation5 + $0x20] ss:$8 sps:$4 sm:$0xff]   ;;  %s271_s11 = scalar_lea.vmem [#allocation8], %s801_s6  ;;  %s844_s12 = sshll.u32 %s1213_s22, 9 }
  0x70   : > { %435 = vmatprep.subr.bf16.mxu0 %v953_v4  ;;  %v959_v11 = vld [vmem:[#allocation5 + $0x34] ss:$8 sps:$4 sm:$0xff]   ;;  %v961_v12 = vld [vmem:[#allocation5 + $0x30] ss:$8 sps:$4 sm:$0xff]   ;;  %v962_v13 = vld [vmem:[#allocation5 + $0x44] ss:$8 sps:$4 sm:$0xff]   ;;  %s1420_s6 = scalar_lea.hbm %s1468_s5, %s844_s12 }
  0x71   : > { %289 = vrot.lane.b32.xlu1 %v1381_v1, %s1155_s26  ;;  %281 = vrot.lane.b32.xlu0 %v1381_v1, %s1156_s15  ;;  %v964_v14 = vld [vmem:[#allocation5 + $0x40] ss:$8 sps:$4 sm:$0xff]   ;;  %v965_v17 = vld [vmem:[#allocation5 + $0x54] ss:$8 sps:$4 sm:$0xff]   ;;  %v967_v19 = vld [vmem:[#allocation5 + $0x50] ss:$8 sps:$4 sm:$0xff]  }
  0x72   : > { %v974_v15 = vld [vmem:[#allocation7 + $0x40] sm:$0xff]   ;;  %v976_v18 = vld [vmem:[#allocation7 + $0x48] sm:$0xff]   ;;  %v978_v22 = vld [vmem:[#allocation7 + $0x50] sm:$0xff]   ;;  %s700_s29 = sshll.u32 %s271_s11, 4  ;;  %s687_s10 = scalar_lea.sflag [#allocation4], %s1362_s27  ;;  %s1415_s29 = int_to_ptr.vmem [resolvable:$true] %s700_s29 }
  0x73   : > { %436 = vmatpush1.bf16.msra.mxu0 %v955_v5  ;;  %v975_v16 = vld [vmem:[#allocation7] sm:$0xff]   ;;  %845 = vmatprep.subr.bf16.mxu1 %v974_v15  ;;  %v977_v21 = vld [vmem:[#allocation7 + $0x8] sm:$0xff]   ;;  %v979_v24 = vld [vmem:[#allocation7 + $0x10] sm:$0xff]   ;;  %s1076_s14 = scalar_lea.vmem %s1415_s29, 512  ;;  %s1159_s22 = smov [#allocation8]  }
  0x74   : > { %437 = vmatprep.subr.bf16.mxu0 %v956_v7  ;;  %v968_v20 = vld [vmem:[#allocation5 + $0x64] ss:$8 sps:$4 sm:$0xff]   ;;  %846 = vmatpush3.bf16.msra.mxu1 %v975_v16  ;;  %v970_v23 = vld [vmem:[#allocation5 + $0x60] ss:$8 sps:$4 sm:$0xff]   ;;  %v971_v25 = vld [vmem:[#allocation5 + $0x74] ss:$8 sps:$4 sm:$0xff]   ;;  %v343_v7 = vlaneseq  ;;  %p1077_p2 = scmp.ne.s32.totalorder %s1415_s29, %s1076_s14 }
  0x75   : > { %301 = vrot.lane.b32.xlu1 %v1381_v1, %s1158_s24  ;;  %299 = vrot.lane.b32.xlu0 %v1376_v0, %s1158_s24  ;;  %v980_v26 = vld [vmem:[#allocation7 + $0x58] sm:$0xff]   ;;  %v982_v29 = vld [vmem:[#allocation7 + $0x60] sm:$0xff]   ;;  %v984_v31 = vld [vmem:[#allocation7 + $0x68] sm:$0xff]  }
  0x76   : > { %847 = vmatprep.subr.bf16.mxu1 %v976_v18  ;;  %v973_v27 = vld [vmem:[#allocation5 + $0x70] ss:$8 sps:$4 sm:$0xff]   ;;  %v983_v30 = vld [vmem:[#allocation7 + $0x20] sm:$0xff]   ;;  %v985_v2 = vld [vmem:[#allocation7 + $0x28] sm:$0xff]   ;;  %p1078_p4 = pnand %p1077_p2, %p1310_p8 }
  0x77   : > { %438 = vmatpush1.bf16.msra.mxu0 %v958_v10  ;;  %v981_v28 = vld [vmem:[#allocation7 + $0x18] sm:$0xff]   ;;  %v986_v3 = vld [vmem:[#allocation7 + $0x70] sm:$0xff]  }
  0x78   : > { %439 = vmatprep.subr.bf16.mxu0 %v959_v11  ;;  %848 = vmatpush3.bf16.msra.mxu1 %v977_v21  ;;  %v987_v4 = vld [vmem:[#allocation7 + $0x30] sm:$0xff]   ;;  %v988_v5 = vld [vmem:[#allocation7 + $0x78] sm:$0xff]   ;;  %p1079_p6 = pneg %p1078_p4 }
  0x79   : > { %285 = vrot.lane.b32.xlu1 %v1389_v8, %s1156_s15  ;;  %283 = vrot.lane.b32.xlu0 %v1391_v9, %s1156_s15 }
  0x7a   : > { %849 = vmatprep.subr.bf16.mxu1 %v978_v22 }
  0x7b   : > { %440 = vmatpush1.bf16.msra.mxu0 %v961_v12 }
  0x7c   : > { %441 = vmatprep.subr.bf16.mxu0 %v962_v13  ;;  %850 = vmatpush3.bf16.msra.mxu1 %v979_v24 }
  0x7d   : > { %293 = vrot.lane.b32.xlu1 %v1389_v8, %s1155_s26  ;;  %291 = vrot.lane.b32.xlu0 %v1391_v9, %s1155_s26  ;;  %s1080_s26 = sshll.u32 %s1159_s22, 4  ;;  %s1081_s26 = int_to_ptr.vmem [resolvable:$false] %s1080_s26 }
  0x7e   : > { %851 = vmatprep.subr.bf16.mxu1 %v980_v26  ;;  %s1082_s15 = scalar_lea.vmem %s1081_s26, 1024  ;;  %p1083_p11 = scmp.lt.s32.totalorder %s1415_s29, %s1081_s26 }
  0x7f   : > { %442 = vmatpush1.bf16.msra.mxu0 %v964_v14  ;;  %p1084_p13 = scmp.lt.s32.totalorder %s1082_s15, %s1076_s14 }
  0x80   : > { %443 = vmatprep.subr.bf16.mxu0 %v965_v17  ;;  %852 = vmatpush3.bf16.msra.mxu1 %v981_v28 }
  0x81   : > { %305 = vrot.lane.b32.xlu1 %v1389_v8, %s1158_s24  ;;  %303 = vrot.lane.b32.xlu0 %v1391_v9, %s1158_s24  ;;  %p1085_p3 = por %p1084_p13, %p1083_p11 }
  0x82   : > { %853 = vmatprep.subr.bf16.mxu1 %v982_v29 }
  0x83   : > { %444 = vmatpush1.bf16.msra.mxu0 %v967_v19  ;;  %p1086_p7 = pnand %p1085_p3, %p1079_p6 }
  0x84   : > { %445 = vmatprep.subr.bf16.mxu0 %v968_v20  ;;  %854 = vmatpush3.bf16.msra.mxu1 %v983_v30 }
  0x85   : > { %855 = vmatprep.subr.bf16.mxu1 %v984_v31 }
  0x87   : > { %446 = vmatpush1.bf16.msra.mxu0 %v970_v23 }
  0x88   : > { %447 = vmatprep.subr.bf16.mxu0 %v971_v25  ;;  %856 = vmatpush3.bf16.msra.mxu1 %v985_v2 }
  0x89   : > { %857 = vmatprep.subr.bf16.mxu1 %v986_v3 }
  0x8b   : > { %448 = vmatpush1.bf16.msra.mxu0 %v973_v27 }
  0x8c   : > { %858 = vmatpush3.bf16.msra.mxu1 %v987_v4 }
  0x8d   : > { %859 = vmatprep.subr.bf16.mxu1 %v988_v5 }
  0xdf   : > { %v288_v32 = vpop.permute.xlu1 %287  ;;  %v280_v33 = vpop.permute.xlu0 %279 }
  0xe0   : > { %v295_v36 = vsub.f32 %v280_v33, %v288_v32 }
  0xe3   : > { %v290_v34 = vpop.permute.xlu1 %289  ;;  %v282_v35 = vpop.permute.xlu0 %281 }
  0xe4   : > { %v296_v37 = vsub.f32 %v282_v35, %v290_v34 }
  0xe7   : > { %v302_v38 = vpop.permute.xlu1 %301  ;;  %v300_v39 = vpop.permute.xlu0 %299 }
  0xe8   : > { %v308_v40 = vmul.f32 %v302_v38, %v296_v37  ;;  %v307_v41 = vmul.f32 %v300_v39, %v295_v36 }
  0xea   : > { %v312_v42 = vsub.f32 %v308_v40, %v1381_v1  ;;  %v311_v43 = vsub.f32 %v307_v41, %v1376_v0 }
  0xeb   : > { %v286_v44 = vpop.permute.xlu1 %285  ;;  %v284_v45 = vpop.permute.xlu0 %283 }
  0xec   : > { %v316_v46 = vadd.f32 8.0, %v312_v42  ;;  %v315_v47 = vadd.f32 8.0, %v311_v43  ;;  %v821_v43 = vld [vmem:[%s1467_s4] ss:$0 sm:$0xff] }
  0xee   : > { %v320_v48 = vmax.f32 %v316_v46, 0.0  ;;  %v319_v49 = vmax.f32 %v315_v47, 0.0 }
  0xef   : > { %v294_v50 = vpop.permute.xlu1 %293  ;;  %v292_v51 = vpop.permute.xlu0 %291 }
  0xf0   : > { %v340_v52 = vpack.c.bf16 %v320_v48, %v319_v49  ;;  %v298_v53 = vsub.f32 %v286_v44, %v294_v50  ;;  %v297_v54 = vsub.f32 %v284_v45, %v292_v51 }
  0xf2   : > { %466 = vmatmul.mubr.bf16.vlgmr.msra.gmra.mrb[0].mxu0 %v340_v52 }
  0xf3   : > { %v306_v55 = vpop.permute.xlu1 %305  ;;  %v304_v56 = vpop.permute.xlu0 %303  ;;  %475 = vmatprep.mubr.bf16.mxu0 %v1157_v6  ;;  %v989_v6 = vld [vmem:[#allocation7 + $0x38] sm:$0xff]  }
  0xf4   : > { %v310_v57 = vmul.f32 %v306_v55, %v298_v53  ;;  %v309_v58 = vmul.f32 %v304_v56, %v297_v54  ;;  %860 = vmatpush3.bf16.msra.mxu1 %v989_v6 }
  0xf6   : > { %v314_v59 = vsub.f32 %v310_v57, %v1389_v8  ;;  %v313_v60 = vsub.f32 %v309_v58, %v1391_v9  ;;  %v344_v8 = vshrl.u32 %v343_v7, 7  ;;  %v339_v9 = vld [vmem:[%s1465_s2] sm:$0x3] }
  0xf8   : > { %v318_v61 = vadd.f32 8.0, %v314_v59  ;;  %v317_v62 = vadd.f32 8.0, %v313_v60  ;;  %v345_v10 = vsub.s32 0, %v344_v8  ;;  %v349_v11 = vsub.s32 1, %v344_v8 }
  0xfa   : > { %v322_v63 = vmax.f32 %v318_v61, 0.0  ;;  %v321_v0 = vmax.f32 %v317_v62, 0.0  ;;  %v346_v12 = vrot.slane %v339_v9, %v345_v10  ;;  %v350_v13 = vrot.slane %v339_v9, %v349_v11 }
  0xfc   : > { %v341_v1 = vpack.c.bf16 %v322_v63, %v321_v0 }
  0xfe   : > { %476 = vmatmul.mubr.bf16.gmra.mrb[4].mxu0 %v341_v1 }
 0x1c5   : > { %v467_v14 = vpop.f32.mrb[0].mxu0 }
 0x1c6   : > { %v468_v15 = vadd.f32 %v467_v14, %v346_v12  ;;  %v469_v16 = vpop.f32.mrb[1].mxu0 }
 0x1c7   : > { %v470_v17 = vadd.f32 %v469_v16, %v350_v13  ;;  %v471_v18 = vpop.f32.mrb[2].mxu0 }
 0x1c8   : > { %v472_v19 = vadd.f32 %v471_v18, %v346_v12  ;;  %v473_v20 = vpop.f32.mrb[3].mxu0  ;;  %v486_v22 = vmax.f32 %v468_v15, 0.0 }
 0x1c9   : > { %v474_v21 = vadd.f32 %v473_v20, %v350_v13  ;;  %v487_v24 = vmax.f32 %v470_v17, 0.0 }
 0x1ca   : > { %v488_v23 = vmax.f32 %v472_v19, 0.0 }
 0x1cb   : > { %v489_v25 = vmax.f32 %v474_v21, 0.0 }
 0x1cc   : > { %v527_v26 = vpack.c.bf16 %v488_v23, %v486_v22 }
 0x1cd   : > { %v528_v27 = vpack.c.bf16 %v489_v25, %v487_v24 }
 0x1cf   : > { %665 = vmatprep.mubr.bf16.mxu1 %v528_v27 }
 0x1d0   : > { %666 = vmatmul.mubr.bf16.vlgmr.msra.gmra.mrb[0].mxu1 %v527_v26 }
 0x1d1   : > { %v477_v28 = vpop.f32.mrb[4].mxu0 }
 0x1d2   : > { %v478_v29 = vadd.f32 %v477_v28, %v346_v12  ;;  %v479_v30 = vpop.f32.mrb[5].mxu0 }
 0x1d3   : > { %v480_v31 = vadd.f32 %v479_v30, %v350_v13  ;;  %v481_v32 = vpop.f32.mrb[6].mxu0 }
 0x1d4   : > { %v482_v33 = vadd.f32 %v481_v32, %v346_v12  ;;  %v483_v34 = vpop.f32.mrb[7].mxu0  ;;  %v490_v36 = vmax.f32 %v478_v29, 0.0 }
 0x1d5   : > { %v484_v35 = vadd.f32 %v483_v34, %v350_v13  ;;  %v491_v38 = vmax.f32 %v480_v31, 0.0 }
 0x1d6   : > { %v492_v37 = vmax.f32 %v482_v33, 0.0 }
 0x1d7   : > { %v493_v39 = vmax.f32 %v484_v35, 0.0 }
 0x1d8   : > { %v529_v40 = vpack.c.bf16 %v492_v37, %v490_v36 }
 0x1d9   : > { %v530_v41 = vpack.c.bf16 %v493_v39, %v491_v38 }
 0x1db   : > { %673 = vmatprep.mubr.bf16.mxu1 %v530_v41 }
 0x1dc   : > { %674 = vmatmul.mubr.bf16.gmra.mrb[4].mxu1 %v529_v40 }
 0x2a3   : > { %v861_v42 = vpop.f32.mrb[0].mxu1 }
 0x2a4   : > { %v862_v44 = vpop.f32.mrb[1].mxu1 }
 0x2a5   : > { %v863_v45 = vadd.f32 %v862_v44, %v861_v42  ;;  %v864_v46 = vpop.f32.mrb[2].mxu1 }
 0x2a6   : > { %v865_v47 = vpop.f32.mrb[3].mxu1 }
 0x2a7   : > { %v668_v48 = vadd.f32 %v863_v45, %v821_v43  ;;  %v866_v49 = vadd.f32 %v865_v47, %v864_v46 }
 0x2a9   : > { %682 = vst [vmem:[%s271_s11] sm:$0xff] %v668_v48  ;;  %v671_v50 = vadd.f32 %v866_v49, %v821_v43 }
 0x2ab   : > { %683 = vst [vmem:[%s271_s11 + $0x8] sm:$0xff] %v671_v50 }
 0x2af   : > { %v867_v51 = vpop.f32.mrb[4].mxu1 }
 0x2b0   : > { %v868_v52 = vpop.f32.mrb[5].mxu1 }
 0x2b1   : > { %v869_v53 = vadd.f32 %v868_v52, %v867_v51  ;;  %v870_v54 = vpop.f32.mrb[6].mxu1 }
 0x2b2   : > { %v871_v55 = vpop.f32.mrb[7].mxu1 }
 0x2b3   : > { %v676_v56 = vadd.f32 %v869_v53, %v821_v43  ;;  %v872_v57 = vadd.f32 %v871_v55, %v870_v54 }
 0x2b5   : > { %684 = vst [vmem:[%s271_s11 + $0x10] sm:$0xff] %v676_v56  ;;  %v679_v58 = vadd.f32 %v872_v57, %v821_v43 }
 0x2b7   : > { %685 = vst [vmem:[%s271_s11 + $0x18] sm:$0xff] %v679_v58 }
 0x2b8   : > { %1089 = shalt.err (!%p1086_p7)
}
 0x2b9   : > { %s1090_s24 = scalar_lea.hbm %s1420_s6, 512  ;;  %s1094_s13 = scalar_lea.hbm %s1468_s5, 2048 }
 0x2ba   : > { %p1091_p9 = scmp.ne.s32.totalorder %s1420_s6, %s1090_s24  ;;  %p1095_p5 = scmp.lt.u32.totalorder %s1420_s6, %s1468_s5 }
 0x2bb   : > { %p1096_p10 = scmp.lt.u32.totalorder %s1094_s13, %s1090_s24  ;;  %p1098_p2 = scmp.lt.u32.totalorder %s1090_s24, %s1420_s6 }
 0x2bc   : > { %p1092_p12 = pnand %p1091_p9, %p1310_p8 }
 0x2bd   : > { %p1097_p1 = por %p1096_p10, %p1095_p5 }
 0x2be   : > { %p1093_p0 = pneg %p1092_p12 }
 0x2bf   : > { %p1099_p4 = por %p1098_p2, %p1097_p1 }
 0x2c1   : > { %p1100_p6 = pnand %p1099_p4, %p1093_p0 }
 0x2c3   : > { %1103 = shalt.err (!%p1100_p6)
}
 0x2c4   : > { %s1160_s12 = smov 128   ;;  %s1161_s30 = smov 8  }
 0x2c5   : > { %883 = dma.vmem_to_hbm [thread:$0]  (%p1310_p8), %s1415_s29, 512, %s1420_s6, %s687_s10, %s1160_s12, %s1160_s12, %s1161_s30  }
 0x2c6 PF: > { %p905_p11 = scmp.ge.s32.totalorder %s1146_s21, 2  ;;  %s715_s9 = sand.u32 1, %s1134_s18  }
 0x2c7   : > { %p1483_p13 = scmp.ne.s32.totalorder %s1473_s25, 0  ;;  %s716_s14 = scalar_lea.sflag [#allocation4], %s715_s9 }
 0x2c9   : > { %p897_p3 = pnand %p905_p11, %p1483_p13 }
 0x2cb   : > { %1129 = dma.done.wait (!%p897_p3), %s716_s14, 512  }
 0x2cc   : > { %1131 = vsyncadd (!%p897_p3), %s716_s14, 4294966784  ;;  %p19_p7 = scmp.ge.s32.totalorder %s1297_s23, 6   ;;  %s1484_s18 = smov %s1138_s19 }
 0x2cd   : > { %s1485_s19 = smov %s1142_s20  ;;  %s1486_s20 = smov %s1306_s7 }
 0x2ce   : > { %s1487_s21 = smov %s1297_s23  ;;  %21 = sbr.rel (!%p19_p7) target bundleno = 6 (0x6), region = 93 }
 0x2d5   :  { %721 = vsyncpa [#allocation3], 1 }
 0x2d6   :  { %723 = vsyncpa [#allocation3 + $0x1], 1 }
 0x2d7   :  { %724 = vsyncpa [#allocation6], 1 }
 0x2d8   :  { %725 = vsyncpa [#allocation4], 1 }
 0x2d9   :  { %727 = vsyncpa [#allocation4 + $0x1], 1 }

// kernel: tpu_custom_call.1
= control target key start
LH: loop header
LB: loop body
LE: loop exit
PB: predicated region body
PF: predicated region fallthrough
CT: control target
= control target key end

     0   :  { %10 = vsyncpa [#allocation3], 0  ;;  %s1479_s0 = inlined_call_operand.hbm [shape: f32[128,128], index: 0, kind: input, shape index: {}]   ;;  %s1480_s1 = inlined_call_operand.hbm [shape: bf16[128,256], index: 1, kind: input, shape index: {}]   ;;  %s1481_s2 = inlined_call_operand.vmem [shape: f32[1,256], index: 2, kind: input, shape index: {}]   ;;  %s1482_s3 = inlined_call_operand.hbm [shape: bf16[256,128], index: 3, kind: input, shape index: {}]   ;;  %s1483_s4 = inlined_call_operand.vmem [shape: f32[1,128], index: 4, kind: input, shape index: {}]   ;;  %s1484_s5 = inlined_call_operand.hbm [shape: f32[128,128], index: 5, kind: output, shape index: {}]  }
   0x1   :  { %12 = vsyncpa [#allocation3 + $0x1], 0 }
   0x2   :  { %13 = vsyncpa [#allocation6], 0 }
   0x3   :  { %14 = vsyncpa [#allocation4], 0 }
   0x4   :  { %16 = vsyncpa [#allocation4 + $0x1], 0  ;;  %s1208_s18 = smov 0   ;;  %s1210_s19 = smov 0  }
   0x5   :  { %s1212_s20 = smov 0   ;;  %s1214_s21 = smov 0  }
   0x6 LB: > { %s1229_s22 = sadd.s32 4294967295, %s1162_s21   ;;  %s808_s23 = sadd.s32 4294967294, %s1162_s21   ;;  %s1162_s21 = sphi %s1214_s21, %s1503_s21   ;;  %s1158_s20 = sphi %s1212_s20, %s1502_s20   ;;  %s1154_s19 = sphi %s1210_s19, %s1501_s19   ;;  %s1150_s18 = sphi %s1208_s18, %s1500_s18  }
   0x7   : > { %p42_p0 = scmp.ne.s32.totalorder %s1154_s19, %s1150_s18  ;;  %p1485_p1 = scmp.eq.s32.totalorder %s1229_s22, 0 }
   0x8   : > { %p156_p3 = scmp.eq.s32.totalorder %s808_s23, 3  ;;  %p809_p5 = scmp.ge.s32.totalorder %s1162_s21, 1 }
   0x9   : > { %p1238_p4 = por %p1485_p1, %p42_p0  ;;  %p163_p7 = scmp.lt.s32.totalorder %s1162_s21, 5 }
   0xa   : > { %p1243_p6 = por %p156_p3, %p42_p0  ;;  %s1164_s27 = smov [#allocation5]  }
   0xb   : > { %s1488_s24 = scalar_select %p1238_p4, 1, 0 }
   0xc   : > { %s1489_s25 = scalar_select %p1243_p6, 1, 0 }
   0xd   : > { %p1248_p8 = pnand %p809_p5, %p163_p7  ;;  %s175_s28 = sshll.u32 %s1164_s27, 4  ;;  %s176_s28 = int_to_ptr.vmem [resolvable:$true] %s175_s28 }
   0xe   : > { %s1165_s30 = smov [#allocation7]   ;;  %s1006_s9 = scalar_lea.hbm %s1480_s1, 2048 }
   0xf   : > { %s1490_s26 = scalar_select %p1248_p8, 1, 0 }
  0x10   : > { %p901_p9 = pneg %p1248_p8  ;;  %s191_s6 = sshll.u32 %s1165_s30, 4  ;;  %s1260_s6 = int_to_ptr.vmem [resolvable:$true] %s191_s6 }
  0x11   : > { %p1007_p11 = scmp.ne.s32.totalorder %s1480_s1, %s1006_s9  ;;  %p1013_p3 = scmp.lt.u32.totalorder %s1006_s9, %s1480_s1 }
  0x12   : > { %p1256_p10 = pnand %p901_p9, %p1485_p1 }
  0x14   : > { %p1008_p12 = pneg %p1256_p10 }
  0x16   : > { %p1009_p13 = pnand %p1008_p12, %p1007_p11 }
  0x18   : > { %p1010_p0 = pneg %p1009_p13 }
  0x1a   : > { %p1015_p5 = pnand %p1013_p3, %p1010_p0 }
  0x1c   : > { %1018 = shalt.err (!%p1015_p5)
}
  0x1d   : > { %s1019_s14 = scalar_lea.vmem %s176_s28, 2048  ;;  %p1027_p2 = scmp.lt.s32.totalorder %s176_s28, %s176_s28 }
  0x1e   : > { %p1020_p7 = scmp.ne.s32.totalorder %s176_s28, %s1019_s14  ;;  %p1028_p6 = scmp.lt.s32.totalorder %s1019_s14, %s1019_s14 }
  0x20   : > { %p1022_p9 = pnand %p1020_p7, %p1008_p12  ;;  %p1029_p4 = por %p1028_p6, %p1027_p2 }
  0x22   : > { %p1023_p1 = pneg %p1022_p9 }
  0x24   : > { %p1030_p8 = pnand %p1029_p4, %p1023_p1 }
  0x26   : > { %1033 = shalt.err (!%p1030_p8)
}
  0x27   : > { %s1166_s15 = smov 128   ;;  %s1167_s16 = smov 8  }
  0x28   : > { %904 = dma.hbm_to_vmem [thread:$0]  (!%p1256_p10), %s1480_s1, 2048, %s176_s28, [#allocation6], %s1166_s15, %s1166_s15, %s1167_s16  }
  0x29   : > { %s1034_s7 = scalar_lea.hbm %s1482_s3, 2048 }
  0x2a   : > { %p1035_p1 = scmp.ne.s32.totalorder %s1482_s3, %s1034_s7  ;;  %p1041_p6 = scmp.lt.u32.totalorder %s1034_s7, %s1482_s3 }
  0x2c   : > { %p1037_p2 = pnand %p1035_p1, %p1008_p12 }
  0x2e   : > { %p1038_p4 = pneg %p1037_p2 }
  0x30   : > { %p1043_p8 = pnand %p1041_p6, %p1038_p4 }
  0x32   : > { %1046 = shalt.err (!%p1043_p8)
}
  0x33   : > { %s1047_s28 = scalar_lea.vmem %s1260_s6, 2048  ;;  %p1055_p3 = scmp.lt.s32.totalorder %s1260_s6, %s1260_s6 }
  0x34   : > { %p1048_p11 = scmp.ne.s32.totalorder %s1260_s6, %s1047_s28  ;;  %p1056_p5 = scmp.lt.s32.totalorder %s1047_s28, %s1047_s28 }
  0x36   : > { %p1050_p13 = pnand %p1048_p11, %p1008_p12  ;;  %p1057_p7 = por %p1056_p5, %p1055_p3 }
  0x38   : > { %p1051_p0 = pneg %p1050_p13 }
  0x3a   : > { %p1058_p9 = pnand %p1057_p7, %p1051_p0 }
  0x3c   : > { %1061 = shalt.err (!%p1058_p9)
}
  0x3d   : > { %s1168_s12 = smov 64   ;;  %s1169_s13 = smov 4  }
  0x3e   : > { %907 = dma.hbm_to_vmem [thread:$0]  (!%p1256_p10), %s1482_s3, 2048, %s1260_s6, [#allocation6], %s1168_s12, %s1168_s12, %s1169_s13  }
  0x3f   : > { %s1313_s23 = sadd.s32 1, %s1162_s21   ;;  %s29_s30 = sadd.s32 1, %s1158_s20 }
  0x40   : > { %s26_s27 = ssub.s32 %s1162_s21, %s1313_s23  ;;  %p36_p1 = scmp.ne.s32.totalorder %s1158_s20, %s1154_s19 }
  0x41   : > { %p27_p12 = scmp.eq.s32.totalorder %s26_s27, 0  ;;  %p37_p2 = scmp.eq.s32.totalorder %s1162_s21, 0 }
  0x42   : > { %p1492_p6 = scmp.eq.s32.totalorder %s1229_s22, 3  ;;  %p918_p11 = scmp.lt.s32.totalorder %s1162_s21, 4 }
  0x43   : > { %s1322_s7 = scalar_select %p27_p12, %s1158_s20, %s29_s30  }
  0x44   : > { %p38_p4 = por %p37_p2, %p36_p1  ;;  %p1326_p8 = por %p1492_p6, %p36_p1 }
  0x45   : > { %s208_s29 = sand.u32 1, %s1158_s20   ;;  %s859_s6 = sshll.u32 %s1162_s21, 9 }
  0x46   : > { %s813_s9 = sshll.u32 %s208_s29, 5  ;;  %s1336_s28 = scalar_lea.hbm %s1479_s0, %s859_s6 }
  0x47   : > { %s212_s12 = scalar_lea.vmem [#allocation2], %s813_s9  ;;  %p1340_p10 = pnand %p918_p11, %p38_p4 }
  0x48   : > { %s219_s13 = sshll.u32 %s212_s12, 4  ;;  %s1344_s17 = scalar_lea.sflag [#allocation3], %s208_s29  ;;  %s1338_s13 = int_to_ptr.vmem [resolvable:$true] %s219_s13 }
  0x49   : > { %s1062_s27 = scalar_lea.hbm %s1336_s28, 512  ;;  %p1064_p0 = pneg %p1340_p10 }
  0x4a   : > { %p1063_p13 = scmp.ne.s32.totalorder %s1336_s28, %s1062_s27  ;;  %s1067_s6 = scalar_lea.hbm %s1479_s0, 2048 }
  0x4b   : > { %p1068_p7 = scmp.lt.u32.totalorder %s1336_s28, %s1479_s0  ;;  %p1069_p9 = scmp.lt.u32.totalorder %s1067_s6, %s1062_s27 }
  0x4c   : > { %p1065_p3 = pnand %p1064_p0, %p1063_p13  ;;  %p1071_p1 = scmp.lt.u32.totalorder %s1062_s27, %s1336_s28 }
  0x4d   : > { %p1070_p12 = por %p1069_p9, %p1068_p7 }
  0x4e   : > { %p1066_p5 = pneg %p1065_p3 }
  0x4f   : > { %p1072_p2 = por %p1071_p1, %p1070_p12 }
  0x51   : > { %p1073_p4 = pnand %p1072_p2, %p1066_p5 }
  0x53   : > { %1076 = shalt.err (!%p1073_p4)
}
  0x54   : > { %s1077_s29 = scalar_lea.vmem %s1338_s13, 512  ;;  %s1170_s12 = smov [#allocation2]  }
  0x55   : > { %p1078_p6 = scmp.ne.s32.totalorder %s1338_s13, %s1077_s29  ;;  %s1082_s30 = sshll.u32 %s1170_s12, 4  ;;  %s1083_s30 = int_to_ptr.vmem [resolvable:$false] %s1082_s30 }
  0x56   : > { %s1084_s9 = scalar_lea.vmem %s1083_s30, 1024  ;;  %p1085_p3 = scmp.lt.s32.totalorder %s1338_s13, %s1083_s30 }
  0x57   : > { %p1080_p11 = pnand %p1078_p6, %p1064_p0  ;;  %p1086_p7 = scmp.lt.s32.totalorder %s1084_s9, %s1077_s29 }
  0x59   : > { %p1081_p13 = pneg %p1080_p11  ;;  %p1087_p9 = por %p1086_p7, %p1085_p3 }
  0x5b   : > { %p1088_p12 = pnand %p1087_p9, %p1081_p13 }
  0x5d   : > { %1091 = shalt.err (!%p1088_p12)
}
  0x5e   : > { %911 = dma.hbm_to_vmem [thread:$0]  (!%p1340_p10), %s1336_s28, 512, %s1338_s13, %s1344_s17, %s1166_s15, %s1166_s15, %s1167_s16  }
  0x5f   : > { %p1495_p0 = scmp.ne.s32.totalorder %s1490_s26, 0 }
  0x60   : > { %s1378_s27 = sand.u32 (!%p1495_p0), 1, %s1154_s19   ;;  %p1496_p5 = scmp.ne.s32.totalorder (!%p1495_p0), %s1488_s24, 0 }
  0x61   : > { %231 = sbr.rel (%p1495_p0) target bundleno = 710 (0x2c6), region = 40  ;;  %s817_s6 = sshll.u32 (!%p1495_p0), %s1378_s27, 5 }
  0x62   : > { %s234_s10 = scalar_lea.sflag (!%p1495_p0), [#allocation3], %s1378_s27  ;;  %s237_s14 = scalar_lea.vmem (!%p1495_p0), [#allocation2], %s817_s6 }
  0x68   : > { %1137 = dma.done.wait (%p1496_p5), %s234_s10, 512  }
  0x69   : > { %1139 = vsyncadd (%p1496_p5), %s234_s10, 4294966784  ;;  %p1497_p10 = scmp.eq.s32.totalorder %s1229_s22, 0 }
  0x6b   : > { %1141 = dma.done.wait (%p1497_p10), [#allocation6], 4096   ;;  %p1498_p1 = pmov %p1497_p10 }
  0x6c   : > { %v1392_v0 = vld [vmem:[%s237_s14] sm:$0xff]  ;;  %s1171_s26 = smov 2   ;;  %s1172_s15 = smov 127   ;;  %v1397_v1 = vld [vmem:[%s237_s14 + $0x8] sm:$0xff]  ;;  %v969_v4 = vld [vmem:[#allocation5 + $0x14] ss:$8 sps:$4 sm:$0xff]  }
  0x6d   : > { %1143 = vsyncadd (%p1498_p1), [#allocation6], 4294963200  ;;  %295 = vrot.lane.b32.xlu1 %v1392_v0, %s1171_s26  ;;  %283 = vrot.lane.b32.xlu0 %v1392_v0, %s1172_s15  ;;  %v966_v2 = vld [vmem:[#allocation5 + $0x4] ss:$8 sps:$4 sm:$0xff]   ;;  %v968_v3 = vld [vmem:[#allocation5] ss:$8 sps:$4 sm:$0xff]  }
  0x6e   : > { %449 = vmatprep.subr.bf16.mxu0 %v966_v2  ;;  %v971_v5 = vld [vmem:[#allocation5 + $0x10] ss:$8 sps:$4 sm:$0xff]   ;;  %v1173_v6 = vmov 0   ;;  %v972_v7 = vld [vmem:[#allocation5 + $0x24] ss:$8 sps:$4 sm:$0xff]   ;;  %s1174_s24 = smov 1  }
  0x6f   : > { %450 = vmatpush1.bf16.msra.mxu0 %v968_v3  ;;  %481 = vmatprep.mubr.bf16.mxu0 %v1173_v6  ;;  %v1405_v8 = vld [vmem:[%s237_s14 + $0x18] sm:$0xff]  ;;  %v1407_v9 = vld [vmem:[%s237_s14 + $0x10] sm:$0xff]  ;;  %v974_v10 = vld [vmem:[#allocation5 + $0x20] ss:$8 sps:$4 sm:$0xff]   ;;  %s271_s11 = scalar_lea.vmem [#allocation8], %s817_s6  ;;  %s860_s12 = sshll.u32 %s1229_s22, 9 }
  0x70   : > { %451 = vmatprep.subr.bf16.mxu0 %v969_v4  ;;  %v975_v11 = vld [vmem:[#allocation5 + $0x34] ss:$8 sps:$4 sm:$0xff]   ;;  %v977_v12 = vld [vmem:[#allocation5 + $0x30] ss:$8 sps:$4 sm:$0xff]   ;;  %v978_v13 = vld [vmem:[#allocation5 + $0x44] ss:$8 sps:$4 sm:$0xff]   ;;  %s1436_s6 = scalar_lea.hbm %s1484_s5, %s860_s12 }
  0x71   : > { %297 = vrot.lane.b32.xlu1 %v1397_v1, %s1171_s26  ;;  %285 = vrot.lane.b32.xlu0 %v1397_v1, %s1172_s15  ;;  %v980_v14 = vld [vmem:[#allocation5 + $0x40] ss:$8 sps:$4 sm:$0xff]   ;;  %v981_v17 = vld [vmem:[#allocation5 + $0x54] ss:$8 sps:$4 sm:$0xff]   ;;  %v983_v19 = vld [vmem:[#allocation5 + $0x50] ss:$8 sps:$4 sm:$0xff]  }
  0x72   : > { %v990_v15 = vld [vmem:[#allocation7 + $0x40] sm:$0xff]   ;;  %v992_v18 = vld [vmem:[#allocation7 + $0x48] sm:$0xff]   ;;  %v994_v22 = vld [vmem:[#allocation7 + $0x50] sm:$0xff]   ;;  %s716_s29 = sshll.u32 %s271_s11, 4  ;;  %s703_s10 = scalar_lea.sflag [#allocation4], %s1378_s27  ;;  %s1431_s29 = int_to_ptr.vmem [resolvable:$true] %s716_s29 }
  0x73   : > { %452 = vmatpush1.bf16.msra.mxu0 %v971_v5  ;;  %v991_v16 = vld [vmem:[#allocation7] sm:$0xff]   ;;  %861 = vmatprep.subr.bf16.mxu1 %v990_v15  ;;  %v993_v21 = vld [vmem:[#allocation7 + $0x8] sm:$0xff]   ;;  %v995_v24 = vld [vmem:[#allocation7 + $0x10] sm:$0xff]   ;;  %s1092_s14 = scalar_lea.vmem %s1431_s29, 512  ;;  %s1175_s22 = smov [#allocation8]  }
  0x74   : > { %453 = vmatprep.subr.bf16.mxu0 %v972_v7  ;;  %v984_v20 = vld [vmem:[#allocation5 + $0x64] ss:$8 sps:$4 sm:$0xff]   ;;  %862 = vmatpush3.bf16.msra.mxu1 %v991_v16  ;;  %v986_v23 = vld [vmem:[#allocation5 + $0x60] ss:$8 sps:$4 sm:$0xff]   ;;  %v987_v25 = vld [vmem:[#allocation5 + $0x74] ss:$8 sps:$4 sm:$0xff]   ;;  %v359_v7 = vlaneseq  ;;  %p1093_p2 = scmp.ne.s32.totalorder %s1431_s29, %s1092_s14 }
  0x75   : > { %313 = vrot.lane.b32.xlu1 %v1397_v1, %s1174_s24  ;;  %311 = vrot.lane.b32.xlu0 %v1392_v0, %s1174_s24  ;;  %v996_v26 = vld [vmem:[#allocation7 + $0x58] sm:$0xff]   ;;  %v998_v29 = vld [vmem:[#allocation7 + $0x60] sm:$0xff]   ;;  %v1000_v31 = vld [vmem:[#allocation7 + $0x68] sm:$0xff]  }
  0x76   : > { %863 = vmatprep.subr.bf16.mxu1 %v992_v18  ;;  %v989_v27 = vld [vmem:[#allocation5 + $0x70] ss:$8 sps:$4 sm:$0xff]   ;;  %v999_v30 = vld [vmem:[#allocation7 + $0x20] sm:$0xff]   ;;  %v1001_v2 = vld [vmem:[#allocation7 + $0x28] sm:$0xff]   ;;  %p1094_p4 = pnand %p1093_p2, %p1326_p8 }
  0x77   : > { %454 = vmatpush1.bf16.msra.mxu0 %v974_v10  ;;  %v997_v28 = vld [vmem:[#allocation7 + $0x18] sm:$0xff]   ;;  %v1002_v3 = vld [vmem:[#allocation7 + $0x70] sm:$0xff]  }
  0x78   : > { %455 = vmatprep.subr.bf16.mxu0 %v975_v11  ;;  %864 = vmatpush3.bf16.msra.mxu1 %v993_v21  ;;  %v1003_v4 = vld [vmem:[#allocation7 + $0x30] sm:$0xff]   ;;  %v1004_v5 = vld [vmem:[#allocation7 + $0x78] sm:$0xff]   ;;  %p1095_p6 = pneg %p1094_p4 }
  0x79   : > { %289 = vrot.lane.b32.xlu1 %v1405_v8, %s1172_s15  ;;  %287 = vrot.lane.b32.xlu0 %v1407_v9, %s1172_s15 }
  0x7a   : > { %865 = vmatprep.subr.bf16.mxu1 %v994_v22 }
  0x7b   : > { %456 = vmatpush1.bf16.msra.mxu0 %v977_v12 }
  0x7c   : > { %457 = vmatprep.subr.bf16.mxu0 %v978_v13  ;;  %866 = vmatpush3.bf16.msra.mxu1 %v995_v24 }
  0x7d   : > { %301 = vrot.lane.b32.xlu1 %v1405_v8, %s1171_s26  ;;  %299 = vrot.lane.b32.xlu0 %v1407_v9, %s1171_s26  ;;  %s1096_s26 = sshll.u32 %s1175_s22, 4  ;;  %s1097_s26 = int_to_ptr.vmem [resolvable:$false] %s1096_s26 }
  0x7e   : > { %867 = vmatprep.subr.bf16.mxu1 %v996_v26  ;;  %s1098_s15 = scalar_lea.vmem %s1097_s26, 1024  ;;  %p1099_p11 = scmp.lt.s32.totalorder %s1431_s29, %s1097_s26 }
  0x7f   : > { %458 = vmatpush1.bf16.msra.mxu0 %v980_v14  ;;  %p1100_p13 = scmp.lt.s32.totalorder %s1098_s15, %s1092_s14 }
  0x80   : > { %459 = vmatprep.subr.bf16.mxu0 %v981_v17  ;;  %868 = vmatpush3.bf16.msra.mxu1 %v997_v28 }
  0x81   : > { %317 = vrot.lane.b32.xlu1 %v1405_v8, %s1174_s24  ;;  %315 = vrot.lane.b32.xlu0 %v1407_v9, %s1174_s24  ;;  %p1101_p3 = por %p1100_p13, %p1099_p11 }
  0x82   : > { %869 = vmatprep.subr.bf16.mxu1 %v998_v29 }
  0x83   : > { %460 = vmatpush1.bf16.msra.mxu0 %v983_v19  ;;  %p1102_p7 = pnand %p1101_p3, %p1095_p6 }
  0x84   : > { %461 = vmatprep.subr.bf16.mxu0 %v984_v20  ;;  %870 = vmatpush3.bf16.msra.mxu1 %v999_v30 }
  0x85   : > { %871 = vmatprep.subr.bf16.mxu1 %v1000_v31 }
  0x87   : > { %462 = vmatpush1.bf16.msra.mxu0 %v986_v23 }
  0x88   : > { %463 = vmatprep.subr.bf16.mxu0 %v987_v25  ;;  %872 = vmatpush3.bf16.msra.mxu1 %v1001_v2 }
  0x89   : > { %873 = vmatprep.subr.bf16.mxu1 %v1002_v3 }
  0x8b   : > { %464 = vmatpush1.bf16.msra.mxu0 %v989_v27 }
  0x8c   : > { %874 = vmatpush3.bf16.msra.mxu1 %v1003_v4 }
  0x8d   : > { %875 = vmatprep.subr.bf16.mxu1 %v1004_v5 }
  0xdf   : > { %v296_v32 = vpop.permute.xlu1 %295  ;;  %v284_v33 = vpop.permute.xlu0 %283 }
  0xe0   : > { %v307_v36 = vsub.f32 %v284_v33, %v296_v32 }
  0xe3   : > { %v298_v34 = vpop.permute.xlu1 %297  ;;  %v286_v35 = vpop.permute.xlu0 %285 }
  0xe4   : > { %v308_v37 = vsub.f32 %v286_v35, %v298_v34 }
  0xe7   : > { %v314_v38 = vpop.permute.xlu1 %313  ;;  %v312_v39 = vpop.permute.xlu0 %311 }
  0xe8   : > { %v324_v40 = vmul.f32 %v314_v38, %v308_v37  ;;  %v323_v41 = vmul.f32 %v312_v39, %v307_v36 }
  0xea   : > { %v328_v42 = vsub.f32 %v324_v40, %v1397_v1  ;;  %v327_v43 = vsub.f32 %v323_v41, %v1392_v0 }
  0xeb   : > { %v290_v44 = vpop.permute.xlu1 %289  ;;  %v288_v45 = vpop.permute.xlu0 %287 }
  0xec   : > { %v332_v46 = vadd.f32 8.0, %v328_v42  ;;  %v331_v47 = vadd.f32 8.0, %v327_v43  ;;  %v837_v43 = vld [vmem:[%s1483_s4] ss:$0 sm:$0xff] }
  0xee   : > { %v336_v48 = vmax.f32 %v332_v46, 0.0  ;;  %v335_v49 = vmax.f32 %v331_v47, 0.0 }
  0xef   : > { %v302_v50 = vpop.permute.xlu1 %301  ;;  %v300_v51 = vpop.permute.xlu0 %299 }
  0xf0   : > { %v356_v52 = vpack.c.bf16 %v336_v48, %v335_v49  ;;  %v310_v53 = vsub.f32 %v290_v44, %v302_v50  ;;  %v309_v54 = vsub.f32 %v288_v45, %v300_v51 }
  0xf2   : > { %482 = vmatmul.mubr.bf16.vlgmr.msra.gmra.mrb[0].mxu0 %v356_v52 }
  0xf3   : > { %v318_v55 = vpop.permute.xlu1 %317  ;;  %v316_v56 = vpop.permute.xlu0 %315  ;;  %491 = vmatprep.mubr.bf16.mxu0 %v1173_v6  ;;  %v1005_v6 = vld [vmem:[#allocation7 + $0x38] sm:$0xff]  }
  0xf4   : > { %v326_v57 = vmul.f32 %v318_v55, %v310_v53  ;;  %v325_v58 = vmul.f32 %v316_v56, %v309_v54  ;;  %876 = vmatpush3.bf16.msra.mxu1 %v1005_v6 }
  0xf6   : > { %v330_v59 = vsub.f32 %v326_v57, %v1405_v8  ;;  %v329_v60 = vsub.f32 %v325_v58, %v1407_v9  ;;  %v360_v8 = vshrl.u32 %v359_v7, 7  ;;  %v355_v9 = vld [vmem:[%s1481_s2] sm:$0x3] }
  0xf8   : > { %v334_v61 = vadd.f32 8.0, %v330_v59  ;;  %v333_v62 = vadd.f32 8.0, %v329_v60  ;;  %v361_v10 = vsub.s32 0, %v360_v8  ;;  %v365_v11 = vsub.s32 1, %v360_v8 }
  0xfa   : > { %v338_v63 = vmax.f32 %v334_v61, 0.0  ;;  %v337_v0 = vmax.f32 %v333_v62, 0.0  ;;  %v362_v12 = vrot.slane %v355_v9, %v361_v10  ;;  %v366_v13 = vrot.slane %v355_v9, %v365_v11 }
  0xfc   : > { %v357_v1 = vpack.c.bf16 %v338_v63, %v337_v0 }
  0xfe   : > { %492 = vmatmul.mubr.bf16.gmra.mrb[4].mxu0 %v357_v1 }
 0x1c5   : > { %v483_v14 = vpop.f32.mrb[0].mxu0 }
 0x1c6   : > { %v484_v15 = vadd.f32 %v483_v14, %v362_v12  ;;  %v485_v16 = vpop.f32.mrb[1].mxu0 }
 0x1c7   : > { %v486_v17 = vadd.f32 %v485_v16, %v366_v13  ;;  %v487_v18 = vpop.f32.mrb[2].mxu0 }
 0x1c8   : > { %v488_v19 = vadd.f32 %v487_v18, %v362_v12  ;;  %v489_v20 = vpop.f32.mrb[3].mxu0  ;;  %v502_v22 = vmax.f32 %v484_v15, 0.0 }
 0x1c9   : > { %v490_v21 = vadd.f32 %v489_v20, %v366_v13  ;;  %v503_v24 = vmax.f32 %v486_v17, 0.0 }
 0x1ca   : > { %v504_v23 = vmax.f32 %v488_v19, 0.0 }
 0x1cb   : > { %v505_v25 = vmax.f32 %v490_v21, 0.0 }
 0x1cc   : > { %v543_v26 = vpack.c.bf16 %v504_v23, %v502_v22 }
 0x1cd   : > { %v544_v27 = vpack.c.bf16 %v505_v25, %v503_v24 }
 0x1cf   : > { %681 = vmatprep.mubr.bf16.mxu1 %v544_v27 }
 0x1d0   : > { %682 = vmatmul.mubr.bf16.vlgmr.msra.gmra.mrb[0].mxu1 %v543_v26 }
 0x1d1   : > { %v493_v28 = vpop.f32.mrb[4].mxu0 }
 0x1d2   : > { %v494_v29 = vadd.f32 %v493_v28, %v362_v12  ;;  %v495_v30 = vpop.f32.mrb[5].mxu0 }
 0x1d3   : > { %v496_v31 = vadd.f32 %v495_v30, %v366_v13  ;;  %v497_v32 = vpop.f32.mrb[6].mxu0 }
 0x1d4   : > { %v498_v33 = vadd.f32 %v497_v32, %v362_v12  ;;  %v499_v34 = vpop.f32.mrb[7].mxu0  ;;  %v506_v36 = vmax.f32 %v494_v29, 0.0 }
 0x1d5   : > { %v500_v35 = vadd.f32 %v499_v34, %v366_v13  ;;  %v507_v38 = vmax.f32 %v496_v31, 0.0 }
 0x1d6   : > { %v508_v37 = vmax.f32 %v498_v33, 0.0 }
 0x1d7   : > { %v509_v39 = vmax.f32 %v500_v35, 0.0 }
 0x1d8   : > { %v545_v40 = vpack.c.bf16 %v508_v37, %v506_v36 }
 0x1d9   : > { %v546_v41 = vpack.c.bf16 %v509_v39, %v507_v38 }
 0x1db   : > { %689 = vmatprep.mubr.bf16.mxu1 %v546_v41 }
 0x1dc   : > { %690 = vmatmul.mubr.bf16.gmra.mrb[4].mxu1 %v545_v40 }
 0x2a3   : > { %v877_v42 = vpop.f32.mrb[0].mxu1 }
 0x2a4   : > { %v878_v44 = vpop.f32.mrb[1].mxu1 }
 0x2a5   : > { %v879_v45 = vadd.f32 %v878_v44, %v877_v42  ;;  %v880_v46 = vpop.f32.mrb[2].mxu1 }
 0x2a6   : > { %v881_v47 = vpop.f32.mrb[3].mxu1 }
 0x2a7   : > { %v684_v48 = vadd.f32 %v879_v45, %v837_v43  ;;  %v882_v49 = vadd.f32 %v881_v47, %v880_v46 }
 0x2a9   : > { %698 = vst [vmem:[%s271_s11] sm:$0xff] %v684_v48  ;;  %v687_v50 = vadd.f32 %v882_v49, %v837_v43 }
 0x2ab   : > { %699 = vst [vmem:[%s271_s11 + $0x8] sm:$0xff] %v687_v50 }
 0x2af   : > { %v883_v51 = vpop.f32.mrb[4].mxu1 }
 0x2b0   : > { %v884_v52 = vpop.f32.mrb[5].mxu1 }
 0x2b1   : > { %v885_v53 = vadd.f32 %v884_v52, %v883_v51  ;;  %v886_v54 = vpop.f32.mrb[6].mxu1 }
 0x2b2   : > { %v887_v55 = vpop.f32.mrb[7].mxu1 }
 0x2b3   : > { %v692_v56 = vadd.f32 %v885_v53, %v837_v43  ;;  %v888_v57 = vadd.f32 %v887_v55, %v886_v54 }
 0x2b5   : > { %700 = vst [vmem:[%s271_s11 + $0x10] sm:$0xff] %v692_v56  ;;  %v695_v58 = vadd.f32 %v888_v57, %v837_v43 }
 0x2b7   : > { %701 = vst [vmem:[%s271_s11 + $0x18] sm:$0xff] %v695_v58 }
 0x2b8   : > { %1105 = shalt.err (!%p1102_p7)
}
 0x2b9   : > { %s1106_s24 = scalar_lea.hbm %s1436_s6, 512  ;;  %s1110_s13 = scalar_lea.hbm %s1484_s5, 2048 }
 0x2ba   : > { %p1107_p9 = scmp.ne.s32.totalorder %s1436_s6, %s1106_s24  ;;  %p1111_p5 = scmp.lt.u32.totalorder %s1436_s6, %s1484_s5 }
 0x2bb   : > { %p1112_p10 = scmp.lt.u32.totalorder %s1110_s13, %s1106_s24  ;;  %p1114_p2 = scmp.lt.u32.totalorder %s1106_s24, %s1436_s6 }
 0x2bc   : > { %p1108_p12 = pnand %p1107_p9, %p1326_p8 }
 0x2bd   : > { %p1113_p1 = por %p1112_p10, %p1111_p5 }
 0x2be   : > { %p1109_p0 = pneg %p1108_p12 }
 0x2bf   : > { %p1115_p4 = por %p1114_p2, %p1113_p1 }
 0x2c1   : > { %p1116_p6 = pnand %p1115_p4, %p1109_p0 }
 0x2c3   : > { %1119 = shalt.err (!%p1116_p6)
}
 0x2c4   : > { %s1176_s12 = smov 128   ;;  %s1177_s30 = smov 8  }
 0x2c5   : > { %899 = dma.vmem_to_hbm [thread:$0]  (%p1326_p8), %s1431_s29, 512, %s1436_s6, %s703_s10, %s1176_s12, %s1176_s12, %s1177_s30  }
 0x2c6 PF: > { %p921_p11 = scmp.ge.s32.totalorder %s1162_s21, 2  ;;  %s731_s9 = sand.u32 1, %s1150_s18  }
 0x2c7   : > { %p1499_p13 = scmp.ne.s32.totalorder %s1489_s25, 0  ;;  %s732_s14 = scalar_lea.sflag [#allocation4], %s731_s9 }
 0x2c9   : > { %p913_p3 = pnand %p921_p11, %p1499_p13 }
 0x2cb   : > { %1145 = dma.done.wait (!%p913_p3), %s732_s14, 512  }
 0x2cc   : > { %1147 = vsyncadd (!%p913_p3), %s732_s14, 4294966784  ;;  %p19_p7 = scmp.ge.s32.totalorder %s1313_s23, 6   ;;  %s1500_s18 = smov %s1154_s19 }
 0x2cd   : > { %s1501_s19 = smov %s1158_s20  ;;  %s1502_s20 = smov %s1322_s7 }
 0x2ce   : > { %s1503_s21 = smov %s1313_s23  ;;  %21 = sbr.rel (!%p19_p7) target bundleno = 6 (0x6), region = 93 }
 0x2d5   :  { %737 = vsyncpa [#allocation3], 1 }
 0x2d6   :  { %739 = vsyncpa [#allocation3 + $0x1], 1 }
 0x2d7   :  { %740 = vsyncpa [#allocation6], 1 }
 0x2d8   :  { %741 = vsyncpa [#allocation4], 1 }
 0x2d9   :  { %743 = vsyncpa [#allocation4 + $0x1], 1 }

</bundles_post_ra>
